<compile_context>
chip_gen: v6e
topology: v6e:2x2x1
jax: 0.10.0
libtpu: 0.0.40
codegen_flags: <defaults>
</compile_context>

<pallas_src>
import functools

import jax
import jax.numpy as jnp
from jax import lax
from jax.experimental import pallas as pl
from jax.experimental.pallas import tpu as pltpu


def _gsconv_kernel(w1_ref, b1_ref, w2_ref, b2_ref, cmask_ref,
                   x_ref, o_ref, x1p_ref, *, H, W):
    # w1_ref   : (c_*C1,)   folded 1x1 conv weight, flat        (SMEM)
    # b1_ref   : (c_,)      folded 1x1 conv bias                (SMEM)
    # w2_ref   : (c_*25,)   folded 5x5 depthwise weight, flat   (SMEM)
    # b2_ref   : (c_,)      folded depthwise bias               (SMEM)
    # cmask_ref: (5, H*W)   column-validity masks for dx-2 in [-2, 2] (VMEM)
    # x_ref    : (NB, C1, H*W)   input block, spatial flattened (VMEM)
    # o_ref    : (NB, 2*c_, H*W) output block                   (VMEM)
    # x1p_ref  : (NB, c_, PADLEN) row-padded flat cv1 act.      (VMEM scratch)
    NB, C1, HW = x_ref.shape
    c_ = o_ref.shape[1] // 2
    PADLEN = x1p_ref.shape[-1]
    OFF = 2 * W + 2            # flat offset of pixel (0, 0) inside the padded scratch

    def out_ch(s):
        # GSConv shuffle as a static output-channel permutation:
        # with x2 = cat(x1, dw): out[:, :c_] = x2[:, 0::2], out[:, c_:] = x2[:, 1::2]
        return s // 2 if s % 2 == 0 else c_ + s // 2

    # Hoisted once per grid step: horizontal border masks (center dx is all
    # ones and skipped below) and the tiny zero borders for the scratch.
    cmask = [cmask_ref[dx] for dx in range(5)]
    zeros_lo = jnp.zeros((OFF,), jnp.float32)
    zeros_hi = jnp.zeros((PADLEN - OFF - HW,), jnp.float32)

    def per_image(b):
        # ---- cv1: 1x1 conv (+folded BN) + SiLU -- lane-dense broadcast FMAs ----
        xs = [x_ref[b, ic] for ic in range(C1)]            # hoist input slabs
        for oc in range(c_):
            acc = xs[0] * w1_ref[oc * C1]
            for ic in range(1, C1):
                acc = acc + xs[ic] * w1_ref[oc * C1 + ic]
            acc = acc + b1_ref[oc]
            act = acc * jax.nn.sigmoid(acc)                 # SiLU (EUP sigmoid)
            o_ref[b, out_ch(oc)] = act.astype(o_ref.dtype)  # shuffled, lane-dense store
            # Stash into the row-padded flat scratch.  Zero only the small
            # borders -- the interior is fully overwritten every step, so this
            # is correct under any grid / multi-core scheduling.
            x1p_ref[b, oc, 0:OFF] = zeros_lo
            x1p_ref[b, oc, OFF + HW:PADLEN] = zeros_hi
            x1p_ref[b, oc, OFF:OFF + HW] = act

        # ---- cv2: 5x5 depthwise conv (+folded BN) + SiLU ----
        # Tap (dy, dx) of output pixel p reads padded-flat index p + dy*W + dx.
        # Vertical out-of-range rows hit the zero pad rows; horizontal
        # out-of-range columns are killed by the per-dx column mask, applied
        # once per dx group after the 5 vertical taps are summed.
        for oc in range(c_):
            wb = oc * 25
            acc = None
            for dx in range(5):
                inner = None
                for dy in range(5):
                    st = dy * W + dx
                    t = x1p_ref[b, oc, st:st + HW] * w2_ref[wb + dy * 5 + dx]
                    inner = t if inner is None else inner + t
                if dx != 2:
                    inner = inner * cmask[dx]
                acc = inner if acc is None else acc + inner
            acc = acc + b2_ref[oc]
            act = acc * jax.nn.sigmoid(acc)
            o_ref[b, out_ch(c_ + oc)] = act.astype(o_ref.dtype)

    if NB <= 4:
        # Tiny batch blocks: full static unroll (best codegen, LLO visibility).
        for b in range(NB):
            per_image(b)
    else:
        # Large batch blocks: bound code size and vreg live ranges.
        def body(b, carry):
            per_image(b)
            return carry
        lax.fori_loop(0, NB, body, 0)


def _pick_block_batch(N, per_image_bytes, target_bytes=512 * 1024):
    """Batch-block size: big enough to amortize the ~0.35us per-step overhead,
    while keeping >= 2 grid steps when N >= 2 (v7x megacore) and dividing N."""
    nb = max(1, min(N, target_bytes // max(per_image_bytes, 1)))
    if N >= 2:
        nb = min(nb, max(1, N // 2))
    while N % nb:
        nb -= 1
    return nb


def gsconv(x, cv1_w, cv1_b, bn1, cv2_w, cv2_b, bn2, *, bn_eps=1e-5,
           block_batch=None):
    """GSConv forward (k=1, s=1, g=1), inference-mode BatchNorm.

    x     : [N, C1, H, W] float32
    cv1_w : [c_, C1, 1, 1], cv1_b: [c_]
    cv2_w : [c_, 1, 5, 5] (depthwise, groups=c_), cv2_b: [c_]
    bn1/bn2: (gamma, beta, running_mean, running_var), each [c_]
    returns [N, 2*c_, H, W] float32
    """
    N, C1, H, W = x.shape
    c_ = cv1_w.shape[0]
    c2 = 2 * c_
    HW = H * W
    PADLEN = (H + 4) * W + 8      # 2 zero rows above / below + a little slack

    g1, be1, m1, v1 = bn1
    g2, be2, m2, v2 = bn2

    # Fold BatchNorm (running stats) into the conv weights / biases; flatten
    # to 1-D so the SMEM copies avoid the 2-D (8,128) padding blow-up.
    s1 = g1 / jnp.sqrt(v1 + bn_eps)
    w1f = (cv1_w.reshape(c_, C1) * s1[:, None]).reshape(-1).astype(jnp.float32)
    b1f = ((cv1_b - m1) * s1 + be1).astype(jnp.float32)

    s2 = g2 / jnp.sqrt(v2 + bn_eps)
    w2f = (cv2_w.reshape(c_, 25) * s2[:, None]).reshape(-1).astype(jnp.float32)
    b2f = ((cv2_b - m2) * s2 + be2).astype(jnp.float32)

    # Column-validity masks for the 5 horizontal tap offsets dx-2 in [-2, 2]
    # (vertical halo is handled by the zero-padded rows in the scratch).
    col = jnp.arange(HW, dtype=jnp.int32) % W
    cmask = jnp.stack(
        [((col + (dx - 2) >= 0) & (col + (dx - 2) < W)) for dx in range(5)]
    ).astype(jnp.float32)

    # Batch-block size and grid.
    in_img_bytes = C1 * HW * 4
    NB = block_batch or _pick_block_batch(N, in_img_bytes)
    grid_n = N // NB

    # Lane-dense views: spatial dims flattened onto the contiguous last dim.
    x_flat = x.reshape(N, C1, HW).astype(jnp.float32)

    # Explicit VMEM budget: double-buffered in/out blocks + masks + scratch.
    blk_bytes = (2 * (NB * C1 * HW + NB * c2 * HW + 5 * HW)
                 + NB * c_ * PADLEN) * 4
    vmem_limit = int(min(max(32 << 20, 4 * blk_bytes), 64 << 20))

    kernel = functools.partial(_gsconv_kernel, H=H, W=W)
    out_flat = pl.pallas_call(
        kernel,
        out_shape=jax.ShapeDtypeStruct((N, c2, HW), jnp.float32),
        grid_spec=pltpu.PrefetchScalarGridSpec(
            num_scalar_prefetch=0,
            grid=(grid_n,),
            in_specs=[
                pl.BlockSpec(memory_space=pltpu.SMEM),            # w1f (c_*C1,)
                pl.BlockSpec(memory_space=pltpu.SMEM),            # b1f (c_,)
                pl.BlockSpec(memory_space=pltpu.SMEM),            # w2f (c_*25,)
                pl.BlockSpec(memory_space=pltpu.SMEM),            # b2f (c_,)
                pl.BlockSpec((5, HW), lambda n: (0, 0)),          # column masks
                pl.BlockSpec((NB, C1, HW), lambda n: (n, 0, 0)),  # x batch block
            ],
            out_specs=pl.BlockSpec((NB, c2, HW), lambda n: (n, 0, 0)),
            scratch_shapes=[pltpu.VMEM((NB, c_, PADLEN), jnp.float32)],
        ),
        compiler_params=pltpu.CompilerParams(
            dimension_semantics=("parallel",),
            vmem_limit_bytes=vmem_limit),
    )(w1f, b1f, w2f, b2f, cmask, x_flat)

    return out_flat.reshape(N, c2, H, W)


if __name__ == "__main__":
    N, C1, C2, H, Wd = 2, 4, 4, 16, 16            # GSConv(c1=4, c2=4), k=1, s=1
    c_ = C2 // 2

    key = jax.random.PRNGKey(0)
    ks = jax.random.split(key, 13)

    x = jax.random.normal(ks[0], (N, C1, H, Wd), dtype=jnp.float32)

    cv1_w = 0.2 * jax.random.normal(ks[1], (c_, C1, 1, 1), dtype=jnp.float32)
    cv1_b = 0.1 * jax.random.normal(ks[2], (c_,), dtype=jnp.float32)
    bn1 = (1.0 + 0.1 * jax.random.normal(ks[3], (c_,), dtype=jnp.float32),  # gamma
           0.1 * jax.random.normal(ks[4], (c_,), dtype=jnp.float32),        # beta
           0.1 * jax.random.normal(ks[5], (c_,), dtype=jnp.float32),        # running_mean
           0.5 + jax.random.uniform(ks[6], (c_,), dtype=jnp.float32))       # running_var

    cv2_w = 0.2 * jax.random.normal(ks[7], (c_, 1, 5, 5), dtype=jnp.float32)
    cv2_b = 0.1 * jax.random.normal(ks[8], (c_,), dtype=jnp.float32)
    bn2 = (1.0 + 0.1 * jax.random.normal(ks[9], (c_,), dtype=jnp.float32),
           0.1 * jax.random.normal(ks[10], (c_,), dtype=jnp.float32),
           0.1 * jax.random.normal(ks[11], (c_,), dtype=jnp.float32),
           0.5 + jax.random.uniform(ks[12], (c_,), dtype=jnp.float32))

    out = gsconv(x, cv1_w, cv1_b, bn1, cv2_w, cv2_b, bn2)
    jax.block_until_ready(out)

    # ---------------- pure-JAX reference (unfused BN, eval mode) ----------------
    def bn_eval(y, bn, eps=1e-5):
        g, b, m, v = bn
        return ((y - m[None, :, None, None])
                / jnp.sqrt(v[None, :, None, None] + eps)
                * g[None, :, None, None] + b[None, :, None, None])

    def silu(y):
        return y * jax.nn.sigmoid(y)

    def ref_gsconv(xx):
        y = jax.lax.conv_general_dilated(
            xx, cv1_w, (1, 1), "VALID",
            dimension_numbers=("NCHW", "OIHW", "NCHW"))
        x1 = silu(bn_eval(y + cv1_b[None, :, None, None], bn1))
        y2 = jax.lax.conv_general_dilated(
            x1, cv2_w, (1, 1), ((2, 2), (2, 2)),
            dimension_numbers=("NCHW", "OIHW", "NCHW"),
            feature_group_count=c_)
        xd = silu(bn_eval(y2 + cv2_b[None, :, None, None], bn2))
        x2 = jnp.concatenate([x1, xd], axis=1)
        b, n, h, w = x2.shape
        yy = x2.reshape(b * n // 2, 2, h * w)
        yy = jnp.transpose(yy, (1, 0, 2)).reshape(2, b, n // 2, h, w)
        return jnp.concatenate([yy[0], yy[1]], axis=1)

    ref = ref_gsconv(x)
    assert out.shape == (N, C2, H, Wd)
    assert jnp.allclose(out, ref, atol=1e-4, rtol=1e-4), \
        float(jnp.max(jnp.abs(out - ref)))

    print("KERNEL_OK")
</pallas_src>

<mosaic_0001>
module attributes {stable_mosaic.version = 11 : i64} {
  func.func @_gsconv_kernel(%arg0: i32, %arg1: memref<8xf32, #tpu.memory_space<smem>>, %arg2: memref<2xf32, #tpu.memory_space<smem>>, %arg3: memref<50xf32, #tpu.memory_space<smem>>, %arg4: memref<2xf32, #tpu.memory_space<smem>>, %arg5: memref<5x256xf32, #tpu.memory_space<vmem>>, %arg6: memref<1x4x256xf32, #tpu.memory_space<vmem>>, %arg7: memref<1x4x256xf32, #tpu.memory_space<vmem>>, %arg8: memref<1x2x328xf32, #tpu.memory_space<vmem>>) attributes {dimension_semantics = [#tpu.dimension_semantics<parallel>], iteration_bounds = array<i64: 2>, scalar_prefetch = 0 : i64, scratch_operands = 1 : i64, tpu.core_type = #tpu.core_type<tc>, window_params = [{transform_indices = @transform_0, window_bounds = array<i64: 8>}, {transform_indices = @transform_1, window_bounds = array<i64: 2>}, {transform_indices = @transform_2, window_bounds = array<i64: 50>}, {transform_indices = @transform_3, window_bounds = array<i64: 2>}, {pipeline_mode = #tpu.pipeline_mode<synchronous>, transform_indices = @transform_4, window_bounds = array<i64: 5, 256>}, {transform_indices = @transform_5, window_bounds = array<i64: 1, 4, 256>}, {transform_indices = @transform_6, window_bounds = array<i64: 1, 4, 256>}]} {
    %c0 = arith.constant 0 : index
    %c0_0 = arith.constant 0 : index
    %0 = vector.load %arg5[%c0, %c0_0] : memref<5x256xf32, #tpu.memory_space<vmem>>, vector<1x256xf32>
    %1 = vector.shape_cast %0 : vector<1x256xf32> to vector<256xf32>
    %c1 = arith.constant 1 : index
    %c0_1 = arith.constant 0 : index
    %2 = vector.load %arg5[%c1, %c0_1] : memref<5x256xf32, #tpu.memory_space<vmem>>, vector<1x256xf32>
    %3 = vector.shape_cast %2 : vector<1x256xf32> to vector<256xf32>
    %c3 = arith.constant 3 : index
    %c0_2 = arith.constant 0 : index
    %4 = vector.load %arg5[%c3, %c0_2] : memref<5x256xf32, #tpu.memory_space<vmem>>, vector<1x256xf32>
    %5 = vector.shape_cast %4 : vector<1x256xf32> to vector<256xf32>
    %c4 = arith.constant 4 : index
    %c0_3 = arith.constant 0 : index
    %6 = vector.load %arg5[%c4, %c0_3] : memref<5x256xf32, #tpu.memory_space<vmem>>, vector<1x256xf32>
    %7 = vector.shape_cast %6 : vector<1x256xf32> to vector<256xf32>
    %cst = arith.constant 0.000000e+00 : f32
    %8 = vector.broadcast %cst : f32 to vector<34xf32>
    %cst_4 = arith.constant 0.000000e+00 : f32
    %9 = vector.broadcast %cst_4 : f32 to vector<38xf32>
    %c0_5 = arith.constant 0 : index
    %c0_6 = arith.constant 0 : index
    %c0_7 = arith.constant 0 : index
    %10 = vector.load %arg6[%c0_5, %c0_6, %c0_7] : memref<1x4x256xf32, #tpu.memory_space<vmem>>, vector<1x1x256xf32>
    %11 = vector.shape_cast %10 : vector<1x1x256xf32> to vector<256xf32>
    %c0_8 = arith.constant 0 : index
    %c1_9 = arith.constant 1 : index
    %c0_10 = arith.constant 0 : index
    %12 = vector.load %arg6[%c0_8, %c1_9, %c0_10] : memref<1x4x256xf32, #tpu.memory_space<vmem>>, vector<1x1x256xf32>
    %13 = vector.shape_cast %12 : vector<1x1x256xf32> to vector<256xf32>
    %c0_11 = arith.constant 0 : index
    %c2 = arith.constant 2 : index
    %c0_12 = arith.constant 0 : index
    %14 = vector.load %arg6[%c0_11, %c2, %c0_12] : memref<1x4x256xf32, #tpu.memory_space<vmem>>, vector<1x1x256xf32>
    %15 = vector.shape_cast %14 : vector<1x1x256xf32> to vector<256xf32>
    %c0_13 = arith.constant 0 : index
    %c3_14 = arith.constant 3 : index
    %c0_15 = arith.constant 0 : index
    %16 = vector.load %arg6[%c0_13, %c3_14, %c0_15] : memref<1x4x256xf32, #tpu.memory_space<vmem>>, vector<1x1x256xf32>
    %17 = vector.shape_cast %16 : vector<1x1x256xf32> to vector<256xf32>
    %c0_16 = arith.constant 0 : index
    %18 = memref.load %arg1[%c0_16] : memref<8xf32, #tpu.memory_space<smem>>
    %19 = vector.broadcast %18 : f32 to vector<256xf32>
    %20 = arith.mulf %11, %19 : vector<256xf32>
    %c1_17 = arith.constant 1 : index
    %21 = memref.load %arg1[%c1_17] : memref<8xf32, #tpu.memory_space<smem>>
    %22 = vector.broadcast %21 : f32 to vector<256xf32>
    %23 = arith.mulf %13, %22 : vector<256xf32>
    %24 = arith.addf %20, %23 : vector<256xf32>
    %c2_18 = arith.constant 2 : index
    %25 = memref.load %arg1[%c2_18] : memref<8xf32, #tpu.memory_space<smem>>
    %26 = vector.broadcast %25 : f32 to vector<256xf32>
    %27 = arith.mulf %15, %26 : vector<256xf32>
    %28 = arith.addf %24, %27 : vector<256xf32>
    %c3_19 = arith.constant 3 : index
    %29 = memref.load %arg1[%c3_19] : memref<8xf32, #tpu.memory_space<smem>>
    %30 = vector.broadcast %29 : f32 to vector<256xf32>
    %31 = arith.mulf %17, %30 : vector<256xf32>
    %32 = arith.addf %28, %31 : vector<256xf32>
    %c0_20 = arith.constant 0 : index
    %33 = memref.load %arg2[%c0_20] : memref<2xf32, #tpu.memory_space<smem>>
    %34 = vector.broadcast %33 : f32 to vector<256xf32>
    %35 = arith.addf %32, %34 : vector<256xf32>
    %36 = arith.negf %35 : vector<256xf32>
    %37 = math.exp %36 : vector<256xf32>
    %cst_21 = arith.constant 1.000000e+00 : f32
    %38 = vector.broadcast %cst_21 : f32 to vector<256xf32>
    %39 = arith.addf %38, %37 : vector<256xf32>
    %40 = arith.divf %38, %39 : vector<256xf32>
    %41 = arith.mulf %35, %40 : vector<256xf32>
    %c0_22 = arith.constant 0 : index
    %c0_23 = arith.constant 0 : index
    %c0_24 = arith.constant 0 : index
    %42 = vector.load %arg7[%c0_22, %c0_23, %c0_24] : memref<1x4x256xf32, #tpu.memory_space<vmem>>, vector<1x1x256xf32>
    %43 = vector.shape_cast %42 : vector<1x1x256xf32> to vector<256xf32>
    %44 = vector.shape_cast %41 : vector<256xf32> to vector<1x1x256xf32>
    tpu.vector_store %arg7[%c0_22, %c0_23, %c0_24], %44 {strides = array<i32>} : memref<1x4x256xf32, #tpu.memory_space<vmem>>, vector<1x1x256xf32>,
    %c0_25 = arith.constant 0 : index
    %c0_26 = arith.constant 0 : index
    %c0_27 = arith.constant 0 : index
    %45 = vector.load %arg8[%c0_25, %c0_26, %c0_27] : memref<1x2x328xf32, #tpu.memory_space<vmem>>, vector<1x1x34xf32>
    %46 = vector.shape_cast %45 : vector<1x1x34xf32> to vector<34xf32>
    %47 = vector.shape_cast %8 : vector<34xf32> to vector<1x1x34xf32>
    tpu.vector_store %arg8[%c0_25, %c0_26, %c0_27], %47 {strides = array<i32>} : memref<1x2x328xf32, #tpu.memory_space<vmem>>, vector<1x1x34xf32>,
    %c0_28 = arith.constant 0 : index
    %c0_29 = arith.constant 0 : index
    %c290 = arith.constant 290 : index
    %48 = vector.load %arg8[%c0_28, %c0_29, %c290] : memref<1x2x328xf32, #tpu.memory_space<vmem>>, vector<1x1x38xf32>
    %49 = vector.shape_cast %48 : vector<1x1x38xf32> to vector<38xf32>
    %50 = vector.shape_cast %9 : vector<38xf32> to vector<1x1x38xf32>
    tpu.vector_store %arg8[%c0_28, %c0_29, %c290], %50 {strides = array<i32>} : memref<1x2x328xf32, #tpu.memory_space<vmem>>, vector<1x1x38xf32>,
    %c0_30 = arith.constant 0 : index
    %c0_31 = arith.constant 0 : index
    %c34 = arith.constant 34 : index
    %51 = vector.load %arg8[%c0_30, %c0_31, %c34] : memref<1x2x328xf32, #tpu.memory_space<vmem>>, vector<1x1x256xf32>
    %52 = vector.shape_cast %51 : vector<1x1x256xf32> to vector<256xf32>
    %53 = vector.shape_cast %41 : vector<256xf32> to vector<1x1x256xf32>
    tpu.vector_store %arg8[%c0_30, %c0_31, %c34], %53 {strides = array<i32>} : memref<1x2x328xf32, #tpu.memory_space<vmem>>, vector<1x1x256xf32>,
    %c4_32 = arith.constant 4 : index
    %54 = memref.load %arg1[%c4_32] : memref<8xf32, #tpu.memory_space<smem>>
    %55 = vector.broadcast %54 : f32 to vector<256xf32>
    %56 = arith.mulf %11, %55 : vector<256xf32>
    %c5 = arith.constant 5 : index
    %57 = memref.load %arg1[%c5] : memref<8xf32, #tpu.memory_space<smem>>
    %58 = vector.broadcast %57 : f32 to vector<256xf32>
    %59 = arith.mulf %13, %58 : vector<256xf32>
    %60 = arith.addf %56, %59 : vector<256xf32>
    %c6 = arith.constant 6 : index
    %61 = memref.load %arg1[%c6] : memref<8xf32, #tpu.memory_space<smem>>
    %62 = vector.broadcast %61 : f32 to vector<256xf32>
    %63 = arith.mulf %15, %62 : vector<256xf32>
    %64 = arith.addf %60, %63 : vector<256xf32>
    %c7 = arith.constant 7 : index
    %65 = memref.load %arg1[%c7] : memref<8xf32, #tpu.memory_space<smem>>
    %66 = vector.broadcast %65 : f32 to vector<256xf32>
    %67 = arith.mulf %17, %66 : vector<256xf32>
    %68 = arith.addf %64, %67 : vector<256xf32>
    %c1_33 = arith.constant 1 : index
    %69 = memref.load %arg2[%c1_33] : memref<2xf32, #tpu.memory_space<smem>>
    %70 = vector.broadcast %69 : f32 to vector<256xf32>
    %71 = arith.addf %68, %70 : vector<256xf32>
    %72 = arith.negf %71 : vector<256xf32>
    %73 = math.exp %72 : vector<256xf32>
    %cst_34 = arith.constant 1.000000e+00 : f32
    %74 = vector.broadcast %cst_34 : f32 to vector<256xf32>
    %75 = arith.addf %74, %73 : vector<256xf32>
    %76 = arith.divf %74, %75 : vector<256xf32>
    %77 = arith.mulf %71, %76 : vector<256xf32>
    %c0_35 = arith.constant 0 : index
    %c2_36 = arith.constant 2 : index
    %c0_37 = arith.constant 0 : index
    %78 = vector.load %arg7[%c0_35, %c2_36, %c0_37] : memref<1x4x256xf32, #tpu.memory_space<vmem>>, vector<1x1x256xf32>
    %79 = vector.shape_cast %78 : vector<1x1x256xf32> to vector<256xf32>
    %80 = vector.shape_cast %77 : vector<256xf32> to vector<1x1x256xf32>
    tpu.vector_store %arg7[%c0_35, %c2_36, %c0_37], %80 {strides = array<i32>} : memref<1x4x256xf32, #tpu.memory_space<vmem>>, vector<1x1x256xf32>,
    %c0_38 = arith.constant 0 : index
    %c1_39 = arith.constant 1 : index
    %c0_40 = arith.constant 0 : index
    %81 = vector.load %arg8[%c0_38, %c1_39, %c0_40] : memref<1x2x328xf32, #tpu.memory_space<vmem>>, vector<1x1x34xf32>
    %82 = vector.shape_cast %81 : vector<1x1x34xf32> to vector<34xf32>
    %83 = vector.shape_cast %8 : vector<34xf32> to vector<1x1x34xf32>
    tpu.vector_store %arg8[%c0_38, %c1_39, %c0_40], %83 {strides = array<i32>} : memref<1x2x328xf32, #tpu.memory_space<vmem>>, vector<1x1x34xf32>,
    %c0_41 = arith.constant 0 : index
    %c1_42 = arith.constant 1 : index
    %c290_43 = arith.constant 290 : index
    %84 = vector.load %arg8[%c0_41, %c1_42, %c290_43] : memref<1x2x328xf32, #tpu.memory_space<vmem>>, vector<1x1x38xf32>
    %85 = vector.shape_cast %84 : vector<1x1x38xf32> to vector<38xf32>
    %86 = vector.shape_cast %9 : vector<38xf32> to vector<1x1x38xf32>
    tpu.vector_store %arg8[%c0_41, %c1_42, %c290_43], %86 {strides = array<i32>} : memref<1x2x328xf32, #tpu.memory_space<vmem>>, vector<1x1x38xf32>,
    %c0_44 = arith.constant 0 : index
    %c1_45 = arith.constant 1 : index
    %c34_46 = arith.constant 34 : index
    %87 = vector.load %arg8[%c0_44, %c1_45, %c34_46] : memref<1x2x328xf32, #tpu.memory_space<vmem>>, vector<1x1x256xf32>
    %88 = vector.shape_cast %87 : vector<1x1x256xf32> to vector<256xf32>
    %89 = vector.shape_cast %77 : vector<256xf32> to vector<1x1x256xf32>
    tpu.vector_store %arg8[%c0_44, %c1_45, %c34_46], %89 {strides = array<i32>} : memref<1x2x328xf32, #tpu.memory_space<vmem>>, vector<1x1x256xf32>,
    %c0_47 = arith.constant 0 : index
    %c0_48 = arith.constant 0 : index
    %c0_49 = arith.constant 0 : index
    %90 = vector.load %arg8[%c0_47, %c0_48, %c0_49] : memref<1x2x328xf32, #tpu.memory_space<vmem>>, vector<1x1x256xf32>
    %91 = vector.shape_cast %90 : vector<1x1x256xf32> to vector<256xf32>
    %c0_50 = arith.constant 0 : index
    %92 = memref.load %arg3[%c0_50] : memref<50xf32, #tpu.memory_space<smem>>
    %93 = vector.broadcast %92 : f32 to vector<256xf32>
    %94 = arith.mulf %91, %93 : vector<256xf32>
    %c0_51 = arith.constant 0 : index
    %c0_52 = arith.constant 0 : index
    %c16 = arith.constant 16 : index
    %95 = vector.load %arg8[%c0_51, %c0_52, %c16] : memref<1x2x328xf32, #tpu.memory_space<vmem>>, vector<1x1x256xf32>
    %96 = vector.shape_cast %95 : vector<1x1x256xf32> to vector<256xf32>
    %c5_53 = arith.constant 5 : index
    %97 = memref.load %arg3[%c5_53] : memref<50xf32, #tpu.memory_space<smem>>
    %98 = vector.broadcast %97 : f32 to vector<256xf32>
    %99 = arith.mulf %96, %98 : vector<256xf32>
    %100 = arith.addf %94, %99 : vector<256xf32>
    %c0_54 = arith.constant 0 : index
    %c0_55 = arith.constant 0 : index
    %c32 = arith.constant 32 : index
    %101 = vector.load %arg8[%c0_54, %c0_55, %c32] : memref<1x2x328xf32, #tpu.memory_space<vmem>>, vector<1x1x256xf32>
    %102 = vector.shape_cast %101 : vector<1x1x256xf32> to vector<256xf32>
    %c10 = arith.constant 10 : index
    %103 = memref.load %arg3[%c10] : memref<50xf32, #tpu.memory_space<smem>>
    %104 = vector.broadcast %103 : f32 to vector<256xf32>
    %105 = arith.mulf %102, %104 : vector<256xf32>
    %106 = arith.addf %100, %105 : vector<256xf32>
    %c0_56 = arith.constant 0 : index
    %c0_57 = arith.constant 0 : index
    %c48 = arith.constant 48 : index
    %107 = vector.load %arg8[%c0_56, %c0_57, %c48] : memref<1x2x328xf32, #tpu.memory_space<vmem>>, vector<1x1x256xf32>
    %108 = vector.shape_cast %107 : vector<1x1x256xf32> to vector<256xf32>
    %c15 = arith.constant 15 : index
    %109 = memref.load %arg3[%c15] : memref<50xf32, #tpu.memory_space<smem>>
    %110 = vector.broadcast %109 : f32 to vector<256xf32>
    %111 = arith.mulf %108, %110 : vector<256xf32>
    %112 = arith.addf %106, %111 : vector<256xf32>
    %c0_58 = arith.constant 0 : index
    %c0_59 = arith.constant 0 : index
    %c64 = arith.constant 64 : index
    %113 = vector.load %arg8[%c0_58, %c0_59, %c64] : memref<1x2x328xf32, #tpu.memory_space<vmem>>, vector<1x1x256xf32>
    %114 = vector.shape_cast %113 : vector<1x1x256xf32> to vector<256xf32>
    %c20 = arith.constant 20 : index
    %115 = memref.load %arg3[%c20] : memref<50xf32, #tpu.memory_space<smem>>
    %116 = vector.broadcast %115 : f32 to vector<256xf32>
    %117 = arith.mulf %114, %116 : vector<256xf32>
    %118 = arith.addf %112, %117 : vector<256xf32>
    %119 = arith.mulf %118, %1 : vector<256xf32>
    %c0_60 = arith.constant 0 : index
    %c0_61 = arith.constant 0 : index
    %c1_62 = arith.constant 1 : index
    %120 = vector.load %arg8[%c0_60, %c0_61, %c1_62] : memref<1x2x328xf32, #tpu.memory_space<vmem>>, vector<1x1x256xf32>
    %121 = vector.shape_cast %120 : vector<1x1x256xf32> to vector<256xf32>
    %c1_63 = arith.constant 1 : index
    %122 = memref.load %arg3[%c1_63] : memref<50xf32, #tpu.memory_space<smem>>
    %123 = vector.broadcast %122 : f32 to vector<256xf32>
    %124 = arith.mulf %121, %123 : vector<256xf32>
    %c0_64 = arith.constant 0 : index
    %c0_65 = arith.constant 0 : index
    %c17 = arith.constant 17 : index
    %125 = vector.load %arg8[%c0_64, %c0_65, %c17] : memref<1x2x328xf32, #tpu.memory_space<vmem>>, vector<1x1x256xf32>
    %126 = vector.shape_cast %125 : vector<1x1x256xf32> to vector<256xf32>
    %c6_66 = arith.constant 6 : index
    %127 = memref.load %arg3[%c6_66] : memref<50xf32, #tpu.memory_space<smem>>
    %128 = vector.broadcast %127 : f32 to vector<256xf32>
    %129 = arith.mulf %126, %128 : vector<256xf32>
    %130 = arith.addf %124, %129 : vector<256xf32>
    %c0_67 = arith.constant 0 : index
    %c0_68 = arith.constant 0 : index
    %c33 = arith.constant 33 : index
    %131 = vector.load %arg8[%c0_67, %c0_68, %c33] : memref<1x2x328xf32, #tpu.memory_space<vmem>>, vector<1x1x256xf32>
    %132 = vector.shape_cast %131 : vector<1x1x256xf32> to vector<256xf32>
    %c11 = arith.constant 11 : index
    %133 = memref.load %arg3[%c11] : memref<50xf32, #tpu.memory_space<smem>>
    %134 = vector.broadcast %133 : f32 to vector<256xf32>
    %135 = arith.mulf %132, %134 : vector<256xf32>
    %136 = arith.addf %130, %135 : vector<256xf32>
    %c0_69 = arith.constant 0 : index
    %c0_70 = arith.constant 0 : index
    %c49 = arith.constant 49 : index
    %137 = vector.load %arg8[%c0_69, %c0_70, %c49] : memref<1x2x328xf32, #tpu.memory_space<vmem>>, vector<1x1x256xf32>
    %138 = vector.shape_cast %137 : vector<1x1x256xf32> to vector<256xf32>
    %c16_71 = arith.constant 16 : index
    %139 = memref.load %arg3[%c16_71] : memref<50xf32, #tpu.memory_space<smem>>
    %140 = vector.broadcast %139 : f32 to vector<256xf32>
    %141 = arith.mulf %138, %140 : vector<256xf32>
    %142 = arith.addf %136, %141 : vector<256xf32>
    %c0_72 = arith.constant 0 : index
    %c0_73 = arith.constant 0 : index
    %c65 = arith.constant 65 : index
    %143 = vector.load %arg8[%c0_72, %c0_73, %c65] : memref<1x2x328xf32, #tpu.memory_space<vmem>>, vector<1x1x256xf32>
    %144 = vector.shape_cast %143 : vector<1x1x256xf32> to vector<256xf32>
    %c21 = arith.constant 21 : index
    %145 = memref.load %arg3[%c21] : memref<50xf32, #tpu.memory_space<smem>>
    %146 = vector.broadcast %145 : f32 to vector<256xf32>
    %147 = arith.mulf %144, %146 : vector<256xf32>
    %148 = arith.addf %142, %147 : vector<256xf32>
    %149 = arith.mulf %148, %3 : vector<256xf32>
    %150 = arith.addf %119, %149 : vector<256xf32>
    %c0_74 = arith.constant 0 : index
    %c0_75 = arith.constant 0 : index
    %c2_76 = arith.constant 2 : index
    %151 = vector.load %arg8[%c0_74, %c0_75, %c2_76] : memref<1x2x328xf32, #tpu.memory_space<vmem>>, vector<1x1x256xf32>
    %152 = vector.shape_cast %151 : vector<1x1x256xf32> to vector<256xf32>
    %c2_77 = arith.constant 2 : index
    %153 = memref.load %arg3[%c2_77] : memref<50xf32, #tpu.memory_space<smem>>
    %154 = vector.broadcast %153 : f32 to vector<256xf32>
    %155 = arith.mulf %152, %154 : vector<256xf32>
    %c0_78 = arith.constant 0 : index
    %c0_79 = arith.constant 0 : index
    %c18 = arith.constant 18 : index
    %156 = vector.load %arg8[%c0_78, %c0_79, %c18] : memref<1x2x328xf32, #tpu.memory_space<vmem>>, vector<1x1x256xf32>
    %157 = vector.shape_cast %156 : vector<1x1x256xf32> to vector<256xf32>
    %c7_80 = arith.constant 7 : index
    %158 = memref.load %arg3[%c7_80] : memref<50xf32, #tpu.memory_space<smem>>
    %159 = vector.broadcast %158 : f32 to vector<256xf32>
    %160 = arith.mulf %157, %159 : vector<256xf32>
    %161 = arith.addf %155, %160 : vector<256xf32>
    %c0_81 = arith.constant 0 : index
    %c0_82 = arith.constant 0 : index
    %c34_83 = arith.constant 34 : index
    %162 = vector.load %arg8[%c0_81, %c0_82, %c34_83] : memref<1x2x328xf32, #tpu.memory_space<vmem>>, vector<1x1x256xf32>
    %163 = vector.shape_cast %162 : vector<1x1x256xf32> to vector<256xf32>
    %c12 = arith.constant 12 : index
    %164 = memref.load %arg3[%c12] : memref<50xf32, #tpu.memory_space<smem>>
    %165 = vector.broadcast %164 : f32 to vector<256xf32>
    %166 = arith.mulf %163, %165 : vector<256xf32>
    %167 = arith.addf %161, %166 : vector<256xf32>
    %c0_84 = arith.constant 0 : index
    %c0_85 = arith.constant 0 : index
    %c50 = arith.constant 50 : index
    %168 = vector.load %arg8[%c0_84, %c0_85, %c50] : memref<1x2x328xf32, #tpu.memory_space<vmem>>, vector<1x1x256xf32>
    %169 = vector.shape_cast %168 : vector<1x1x256xf32> to vector<256xf32>
    %c17_86 = arith.constant 17 : index
    %170 = memref.load %arg3[%c17_86] : memref<50xf32, #tpu.memory_space<smem>>
    %171 = vector.broadcast %170 : f32 to vector<256xf32>
    %172 = arith.mulf %169, %171 : vector<256xf32>
    %173 = arith.addf %167, %172 : vector<256xf32>
    %c0_87 = arith.constant 0 : index
    %c0_88 = arith.constant 0 : index
    %c66 = arith.constant 66 : index
    %174 = vector.load %arg8[%c0_87, %c0_88, %c66] : memref<1x2x328xf32, #tpu.memory_space<vmem>>, vector<1x1x256xf32>
    %175 = vector.shape_cast %174 : vector<1x1x256xf32> to vector<256xf32>
    %c22 = arith.constant 22 : index
    %176 = memref.load %arg3[%c22] : memref<50xf32, #tpu.memory_space<smem>>
    %177 = vector.broadcast %176 : f32 to vector<256xf32>
    %178 = arith.mulf %175, %177 : vector<256xf32>
    %179 = arith.addf %173, %178 : vector<256xf32>
    %180 = arith.addf %150, %179 : vector<256xf32>
    %c0_89 = arith.constant 0 : index
    %c0_90 = arith.constant 0 : index
    %c3_91 = arith.constant 3 : index
    %181 = vector.load %arg8[%c0_89, %c0_90, %c3_91] : memref<1x2x328xf32, #tpu.memory_space<vmem>>, vector<1x1x256xf32>
    %182 = vector.shape_cast %181 : vector<1x1x256xf32> to vector<256xf32>
    %c3_92 = arith.constant 3 : index
    %183 = memref.load %arg3[%c3_92] : memref<50xf32, #tpu.memory_space<smem>>
    %184 = vector.broadcast %183 : f32 to vector<256xf32>
    %185 = arith.mulf %182, %184 : vector<256xf32>
    %c0_93 = arith.constant 0 : index
    %c0_94 = arith.constant 0 : index
    %c19 = arith.constant 19 : index
    %186 = vector.load %arg8[%c0_93, %c0_94, %c19] : memref<1x2x328xf32, #tpu.memory_space<vmem>>, vector<1x1x256xf32>
    %187 = vector.shape_cast %186 : vector<1x1x256xf32> to vector<256xf32>
    %c8 = arith.constant 8 : index
    %188 = memref.load %arg3[%c8] : memref<50xf32, #tpu.memory_space<smem>>
    %189 = vector.broadcast %188 : f32 to vector<256xf32>
    %190 = arith.mulf %187, %189 : vector<256xf32>
    %191 = arith.addf %185, %190 : vector<256xf32>
    %c0_95 = arith.constant 0 : index
    %c0_96 = arith.constant 0 : index
    %c35 = arith.constant 35 : index
    %192 = vector.load %arg8[%c0_95, %c0_96, %c35] : memref<1x2x328xf32, #tpu.memory_space<vmem>>, vector<1x1x256xf32>
    %193 = vector.shape_cast %192 : vector<1x1x256xf32> to vector<256xf32>
    %c13 = arith.constant 13 : index
    %194 = memref.load %arg3[%c13] : memref<50xf32, #tpu.memory_space<smem>>
    %195 = vector.broadcast %194 : f32 to vector<256xf32>
    %196 = arith.mulf %193, %195 : vector<256xf32>
    %197 = arith.addf %191, %196 : vector<256xf32>
    %c0_97 = arith.constant 0 : index
    %c0_98 = arith.constant 0 : index
    %c51 = arith.constant 51 : index
    %198 = vector.load %arg8[%c0_97, %c0_98, %c51] : memref<1x2x328xf32, #tpu.memory_space<vmem>>, vector<1x1x256xf32>
    %199 = vector.shape_cast %198 : vector<1x1x256xf32> to vector<256xf32>
    %c18_99 = arith.constant 18 : index
    %200 = memref.load %arg3[%c18_99] : memref<50xf32, #tpu.memory_space<smem>>
    %201 = vector.broadcast %200 : f32 to vector<256xf32>
    %202 = arith.mulf %199, %201 : vector<256xf32>
    %203 = arith.addf %197, %202 : vector<256xf32>
    %c0_100 = arith.constant 0 : index
    %c0_101 = arith.constant 0 : index
    %c67 = arith.constant 67 : index
    %204 = vector.load %arg8[%c0_100, %c0_101, %c67] : memref<1x2x328xf32, #tpu.memory_space<vmem>>, vector<1x1x256xf32>
    %205 = vector.shape_cast %204 : vector<1x1x256xf32> to vector<256xf32>
    %c23 = arith.constant 23 : index
    %206 = memref.load %arg3[%c23] : memref<50xf32, #tpu.memory_space<smem>>
    %207 = vector.broadcast %206 : f32 to vector<256xf32>
    %208 = arith.mulf %205, %207 : vector<256xf32>
    %209 = arith.addf %203, %208 : vector<256xf32>
    %210 = arith.mulf %209, %5 : vector<256xf32>
    %211 = arith.addf %180, %210 : vector<256xf32>
    %c0_102 = arith.constant 0 : index
    %c0_103 = arith.constant 0 : index
    %c4_104 = arith.constant 4 : index
    %212 = vector.load %arg8[%c0_102, %c0_103, %c4_104] : memref<1x2x328xf32, #tpu.memory_space<vmem>>, vector<1x1x256xf32>
    %213 = vector.shape_cast %212 : vector<1x1x256xf32> to vector<256xf32>
    %c4_105 = arith.constant 4 : index
    %214 = memref.load %arg3[%c4_105] : memref<50xf32, #tpu.memory_space<smem>>
    %215 = vector.broadcast %214 : f32 to vector<256xf32>
    %216 = arith.mulf %213, %215 : vector<256xf32>
    %c0_106 = arith.constant 0 : index
    %c0_107 = arith.constant 0 : index
    %c20_108 = arith.constant 20 : index
    %217 = vector.load %arg8[%c0_106, %c0_107, %c20_108] : memref<1x2x328xf32, #tpu.memory_space<vmem>>, vector<1x1x256xf32>
    %218 = vector.shape_cast %217 : vector<1x1x256xf32> to vector<256xf32>
    %c9 = arith.constant 9 : index
    %219 = memref.load %arg3[%c9] : memref<50xf32, #tpu.memory_space<smem>>
    %220 = vector.broadcast %219 : f32 to vector<256xf32>
    %221 = arith.mulf %218, %220 : vector<256xf32>
    %222 = arith.addf %216, %221 : vector<256xf32>
    %c0_109 = arith.constant 0 : index
    %c0_110 = arith.constant 0 : index
    %c36 = arith.constant 36 : index
    %223 = vector.load %arg8[%c0_109, %c0_110, %c36] : memref<1x2x328xf32, #tpu.memory_space<vmem>>, vector<1x1x256xf32>
    %224 = vector.shape_cast %223 : vector<1x1x256xf32> to vector<256xf32>
    %c14 = arith.constant 14 : index
    %225 = memref.load %arg3[%c14] : memref<50xf32, #tpu.memory_space<smem>>
    %226 = vector.broadcast %225 : f32 to vector<256xf32>
    %227 = arith.mulf %224, %226 : vector<256xf32>
    %228 = arith.addf %222, %227 : vector<256xf32>
    %c0_111 = arith.constant 0 : index
    %c0_112 = arith.constant 0 : index
    %c52 = arith.constant 52 : index
    %229 = vector.load %arg8[%c0_111, %c0_112, %c52] : memref<1x2x328xf32, #tpu.memory_space<vmem>>, vector<1x1x256xf32>
    %230 = vector.shape_cast %229 : vector<1x1x256xf32> to vector<256xf32>
    %c19_113 = arith.constant 19 : index
    %231 = memref.load %arg3[%c19_113] : memref<50xf32, #tpu.memory_space<smem>>
    %232 = vector.broadcast %231 : f32 to vector<256xf32>
    %233 = arith.mulf %230, %232 : vector<256xf32>
    %234 = arith.addf %228, %233 : vector<256xf32>
    %c0_114 = arith.constant 0 : index
    %c0_115 = arith.constant 0 : index
    %c68 = arith.constant 68 : index
    %235 = vector.load %arg8[%c0_114, %c0_115, %c68] : memref<1x2x328xf32, #tpu.memory_space<vmem>>, vector<1x1x256xf32>
    %236 = vector.shape_cast %235 : vector<1x1x256xf32> to vector<256xf32>
    %c24 = arith.constant 24 : index
    %237 = memref.load %arg3[%c24] : memref<50xf32, #tpu.memory_space<smem>>
    %238 = vector.broadcast %237 : f32 to vector<256xf32>
    %239 = arith.mulf %236, %238 : vector<256xf32>
    %240 = arith.addf %234, %239 : vector<256xf32>
    %241 = arith.mulf %240, %7 : vector<256xf32>
    %242 = arith.addf %211, %241 : vector<256xf32>
    %c0_116 = arith.constant 0 : index
    %243 = memref.load %arg4[%c0_116] : memref<2xf32, #tpu.memory_space<smem>>
    %244 = vector.broadcast %243 : f32 to vector<256xf32>
    %245 = arith.addf %242, %244 : vector<256xf32>
    %246 = arith.negf %245 : vector<256xf32>
    %247 = math.exp %246 : vector<256xf32>
    %cst_117 = arith.constant 1.000000e+00 : f32
    %248 = vector.broadcast %cst_117 : f32 to vector<256xf32>
    %249 = arith.addf %248, %247 : vector<256xf32>
    %250 = arith.divf %248, %249 : vector<256xf32>
    %251 = arith.mulf %245, %250 : vector<256xf32>
    %c0_118 = arith.constant 0 : index
    %c1_119 = arith.constant 1 : index
    %c0_120 = arith.constant 0 : index
    %252 = vector.load %arg7[%c0_118, %c1_119, %c0_120] : memref<1x4x256xf32, #tpu.memory_space<vmem>>, vector<1x1x256xf32>
    %253 = vector.shape_cast %252 : vector<1x1x256xf32> to vector<256xf32>
    %254 = vector.shape_cast %251 : vector<256xf32> to vector<1x1x256xf32>
    tpu.vector_store %arg7[%c0_118, %c1_119, %c0_120], %254 {strides = array<i32>} : memref<1x4x256xf32, #tpu.memory_space<vmem>>, vector<1x1x256xf32>,
    %c0_121 = arith.constant 0 : index
    %c1_122 = arith.constant 1 : index
    %c0_123 = arith.constant 0 : index
    %255 = vector.load %arg8[%c0_121, %c1_122, %c0_123] : memref<1x2x328xf32, #tpu.memory_space<vmem>>, vector<1x1x256xf32>
    %256 = vector.shape_cast %255 : vector<1x1x256xf32> to vector<256xf32>
    %c25 = arith.constant 25 : index
    %257 = memref.load %arg3[%c25] : memref<50xf32, #tpu.memory_space<smem>>
    %258 = vector.broadcast %257 : f32 to vector<256xf32>
    %259 = arith.mulf %256, %258 : vector<256xf32>
    %c0_124 = arith.constant 0 : index
    %c1_125 = arith.constant 1 : index
    %c16_126 = arith.constant 16 : index
    %260 = vector.load %arg8[%c0_124, %c1_125, %c16_126] : memref<1x2x328xf32, #tpu.memory_space<vmem>>, vector<1x1x256xf32>
    %261 = vector.shape_cast %260 : vector<1x1x256xf32> to vector<256xf32>
    %c30 = arith.constant 30 : index
    %262 = memref.load %arg3[%c30] : memref<50xf32, #tpu.memory_space<smem>>
    %263 = vector.broadcast %262 : f32 to vector<256xf32>
    %264 = arith.mulf %261, %263 : vector<256xf32>
    %265 = arith.addf %259, %264 : vector<256xf32>
    %c0_127 = arith.constant 0 : index
    %c1_128 = arith.constant 1 : index
    %c32_129 = arith.constant 32 : index
    %266 = vector.load %arg8[%c0_127, %c1_128, %c32_129] : memref<1x2x328xf32, #tpu.memory_space<vmem>>, vector<1x1x256xf32>
    %267 = vector.shape_cast %266 : vector<1x1x256xf32> to vector<256xf32>
    %c35_130 = arith.constant 35 : index
    %268 = memref.load %arg3[%c35_130] : memref<50xf32, #tpu.memory_space<smem>>
    %269 = vector.broadcast %268 : f32 to vector<256xf32>
    %270 = arith.mulf %267, %269 : vector<256xf32>
    %271 = arith.addf %265, %270 : vector<256xf32>
    %c0_131 = arith.constant 0 : index
    %c1_132 = arith.constant 1 : index
    %c48_133 = arith.constant 48 : index
    %272 = vector.load %arg8[%c0_131, %c1_132, %c48_133] : memref<1x2x328xf32, #tpu.memory_space<vmem>>, vector<1x1x256xf32>
    %273 = vector.shape_cast %272 : vector<1x1x256xf32> to vector<256xf32>
    %c40 = arith.constant 40 : index
    %274 = memref.load %arg3[%c40] : memref<50xf32, #tpu.memory_space<smem>>
    %275 = vector.broadcast %274 : f32 to vector<256xf32>
    %276 = arith.mulf %273, %275 : vector<256xf32>
    %277 = arith.addf %271, %276 : vector<256xf32>
    %c0_134 = arith.constant 0 : index
    %c1_135 = arith.constant 1 : index
    %c64_136 = arith.constant 64 : index
    %278 = vector.load %arg8[%c0_134, %c1_135, %c64_136] : memref<1x2x328xf32, #tpu.memory_space<vmem>>, vector<1x1x256xf32>
    %279 = vector.shape_cast %278 : vector<1x1x256xf32> to vector<256xf32>
    %c45 = arith.constant 45 : index
    %280 = memref.load %arg3[%c45] : memref<50xf32, #tpu.memory_space<smem>>
    %281 = vector.broadcast %280 : f32 to vector<256xf32>
    %282 = arith.mulf %279, %281 : vector<256xf32>
    %283 = arith.addf %277, %282 : vector<256xf32>
    %284 = arith.mulf %283, %1 : vector<256xf32>
    %c0_137 = arith.constant 0 : index
    %c1_138 = arith.constant 1 : index
    %c1_139 = arith.constant 1 : index
    %285 = vector.load %arg8[%c0_137, %c1_138, %c1_139] : memref<1x2x328xf32, #tpu.memory_space<vmem>>, vector<1x1x256xf32>
    %286 = vector.shape_cast %285 : vector<1x1x256xf32> to vector<256xf32>
    %c26 = arith.constant 26 : index
    %287 = memref.load %arg3[%c26] : memref<50xf32, #tpu.memory_space<smem>>
    %288 = vector.broadcast %287 : f32 to vector<256xf32>
    %289 = arith.mulf %286, %288 : vector<256xf32>
    %c0_140 = arith.constant 0 : index
    %c1_141 = arith.constant 1 : index
    %c17_142 = arith.constant 17 : index
    %290 = vector.load %arg8[%c0_140, %c1_141, %c17_142] : memref<1x2x328xf32, #tpu.memory_space<vmem>>, vector<1x1x256xf32>
    %291 = vector.shape_cast %290 : vector<1x1x256xf32> to vector<256xf32>
    %c31 = arith.constant 31 : index
    %292 = memref.load %arg3[%c31] : memref<50xf32, #tpu.memory_space<smem>>
    %293 = vector.broadcast %292 : f32 to vector<256xf32>
    %294 = arith.mulf %291, %293 : vector<256xf32>
    %295 = arith.addf %289, %294 : vector<256xf32>
    %c0_143 = arith.constant 0 : index
    %c1_144 = arith.constant 1 : index
    %c33_145 = arith.constant 33 : index
    %296 = vector.load %arg8[%c0_143, %c1_144, %c33_145] : memref<1x2x328xf32, #tpu.memory_space<vmem>>, vector<1x1x256xf32>
    %297 = vector.shape_cast %296 : vector<1x1x256xf32> to vector<256xf32>
    %c36_146 = arith.constant 36 : index
    %298 = memref.load %arg3[%c36_146] : memref<50xf32, #tpu.memory_space<smem>>
    %299 = vector.broadcast %298 : f32 to vector<256xf32>
    %300 = arith.mulf %297, %299 : vector<256xf32>
    %301 = arith.addf %295, %300 : vector<256xf32>
    %c0_147 = arith.constant 0 : index
    %c1_148 = arith.constant 1 : index
    %c49_149 = arith.constant 49 : index
    %302 = vector.load %arg8[%c0_147, %c1_148, %c49_149] : memref<1x2x328xf32, #tpu.memory_space<vmem>>, vector<1x1x256xf32>
    %303 = vector.shape_cast %302 : vector<1x1x256xf32> to vector<256xf32>
    %c41 = arith.constant 41 : index
    %304 = memref.load %arg3[%c41] : memref<50xf32, #tpu.memory_space<smem>>
    %305 = vector.broadcast %304 : f32 to vector<256xf32>
    %306 = arith.mulf %303, %305 : vector<256xf32>
    %307 = arith.addf %301, %306 : vector<256xf32>
    %c0_150 = arith.constant 0 : index
    %c1_151 = arith.constant 1 : index
    %c65_152 = arith.constant 65 : index
    %308 = vector.load %arg8[%c0_150, %c1_151, %c65_152] : memref<1x2x328xf32, #tpu.memory_space<vmem>>, vector<1x1x256xf32>
    %309 = vector.shape_cast %308 : vector<1x1x256xf32> to vector<256xf32>
    %c46 = arith.constant 46 : index
    %310 = memref.load %arg3[%c46] : memref<50xf32, #tpu.memory_space<smem>>
    %311 = vector.broadcast %310 : f32 to vector<256xf32>
    %312 = arith.mulf %309, %311 : vector<256xf32>
    %313 = arith.addf %307, %312 : vector<256xf32>
    %314 = arith.mulf %313, %3 : vector<256xf32>
    %315 = arith.addf %284, %314 : vector<256xf32>
    %c0_153 = arith.constant 0 : index
    %c1_154 = arith.constant 1 : index
    %c2_155 = arith.constant 2 : index
    %316 = vector.load %arg8[%c0_153, %c1_154, %c2_155] : memref<1x2x328xf32, #tpu.memory_space<vmem>>, vector<1x1x256xf32>
    %317 = vector.shape_cast %316 : vector<1x1x256xf32> to vector<256xf32>
    %c27 = arith.constant 27 : index
    %318 = memref.load %arg3[%c27] : memref<50xf32, #tpu.memory_space<smem>>
    %319 = vector.broadcast %318 : f32 to vector<256xf32>
    %320 = arith.mulf %317, %319 : vector<256xf32>
    %c0_156 = arith.constant 0 : index
    %c1_157 = arith.constant 1 : index
    %c18_158 = arith.constant 18 : index
    %321 = vector.load %arg8[%c0_156, %c1_157, %c18_158] : memref<1x2x328xf32, #tpu.memory_space<vmem>>, vector<1x1x256xf32>
    %322 = vector.shape_cast %321 : vector<1x1x256xf32> to vector<256xf32>
    %c32_159 = arith.constant 32 : index
    %323 = memref.load %arg3[%c32_159] : memref<50xf32, #tpu.memory_space<smem>>
    %324 = vector.broadcast %323 : f32 to vector<256xf32>
    %325 = arith.mulf %322, %324 : vector<256xf32>
    %326 = arith.addf %320, %325 : vector<256xf32>
    %c0_160 = arith.constant 0 : index
    %c1_161 = arith.constant 1 : index
    %c34_162 = arith.constant 34 : index
    %327 = vector.load %arg8[%c0_160, %c1_161, %c34_162] : memref<1x2x328xf32, #tpu.memory_space<vmem>>, vector<1x1x256xf32>
    %328 = vector.shape_cast %327 : vector<1x1x256xf32> to vector<256xf32>
    %c37 = arith.constant 37 : index
    %329 = memref.load %arg3[%c37] : memref<50xf32, #tpu.memory_space<smem>>
    %330 = vector.broadcast %329 : f32 to vector<256xf32>
    %331 = arith.mulf %328, %330 : vector<256xf32>
    %332 = arith.addf %326, %331 : vector<256xf32>
    %c0_163 = arith.constant 0 : index
    %c1_164 = arith.constant 1 : index
    %c50_165 = arith.constant 50 : index
    %333 = vector.load %arg8[%c0_163, %c1_164, %c50_165] : memref<1x2x328xf32, #tpu.memory_space<vmem>>, vector<1x1x256xf32>
    %334 = vector.shape_cast %333 : vector<1x1x256xf32> to vector<256xf32>
    %c42 = arith.constant 42 : index
    %335 = memref.load %arg3[%c42] : memref<50xf32, #tpu.memory_space<smem>>
    %336 = vector.broadcast %335 : f32 to vector<256xf32>
    %337 = arith.mulf %334, %336 : vector<256xf32>
    %338 = arith.addf %332, %337 : vector<256xf32>
    %c0_166 = arith.constant 0 : index
    %c1_167 = arith.constant 1 : index
    %c66_168 = arith.constant 66 : index
    %339 = vector.load %arg8[%c0_166, %c1_167, %c66_168] : memref<1x2x328xf32, #tpu.memory_space<vmem>>, vector<1x1x256xf32>
    %340 = vector.shape_cast %339 : vector<1x1x256xf32> to vector<256xf32>
    %c47 = arith.constant 47 : index
    %341 = memref.load %arg3[%c47] : memref<50xf32, #tpu.memory_space<smem>>
    %342 = vector.broadcast %341 : f32 to vector<256xf32>
    %343 = arith.mulf %340, %342 : vector<256xf32>
    %344 = arith.addf %338, %343 : vector<256xf32>
    %345 = arith.addf %315, %344 : vector<256xf32>
    %c0_169 = arith.constant 0 : index
    %c1_170 = arith.constant 1 : index
    %c3_171 = arith.constant 3 : index
    %346 = vector.load %arg8[%c0_169, %c1_170, %c3_171] : memref<1x2x328xf32, #tpu.memory_space<vmem>>, vector<1x1x256xf32>
    %347 = vector.shape_cast %346 : vector<1x1x256xf32> to vector<256xf32>
    %c28 = arith.constant 28 : index
    %348 = memref.load %arg3[%c28] : memref<50xf32, #tpu.memory_space<smem>>
    %349 = vector.broadcast %348 : f32 to vector<256xf32>
    %350 = arith.mulf %347, %349 : vector<256xf32>
    %c0_172 = arith.constant 0 : index
    %c1_173 = arith.constant 1 : index
    %c19_174 = arith.constant 19 : index
    %351 = vector.load %arg8[%c0_172, %c1_173, %c19_174] : memref<1x2x328xf32, #tpu.memory_space<vmem>>, vector<1x1x256xf32>
    %352 = vector.shape_cast %351 : vector<1x1x256xf32> to vector<256xf32>
    %c33_175 = arith.constant 33 : index
    %353 = memref.load %arg3[%c33_175] : memref<50xf32, #tpu.memory_space<smem>>
    %354 = vector.broadcast %353 : f32 to vector<256xf32>
    %355 = arith.mulf %352, %354 : vector<256xf32>
    %356 = arith.addf %350, %355 : vector<256xf32>
    %c0_176 = arith.constant 0 : index
    %c1_177 = arith.constant 1 : index
    %c35_178 = arith.constant 35 : index
    %357 = vector.load %arg8[%c0_176, %c1_177, %c35_178] : memref<1x2x328xf32, #tpu.memory_space<vmem>>, vector<1x1x256xf32>
    %358 = vector.shape_cast %357 : vector<1x1x256xf32> to vector<256xf32>
    %c38 = arith.constant 38 : index
    %359 = memref.load %arg3[%c38] : memref<50xf32, #tpu.memory_space<smem>>
    %360 = vector.broadcast %359 : f32 to vector<256xf32>
    %361 = arith.mulf %358, %360 : vector<256xf32>
    %362 = arith.addf %356, %361 : vector<256xf32>
    %c0_179 = arith.constant 0 : index
    %c1_180 = arith.constant 1 : index
    %c51_181 = arith.constant 51 : index
    %363 = vector.load %arg8[%c0_179, %c1_180, %c51_181] : memref<1x2x328xf32, #tpu.memory_space<vmem>>, vector<1x1x256xf32>
    %364 = vector.shape_cast %363 : vector<1x1x256xf32> to vector<256xf32>
    %c43 = arith.constant 43 : index
    %365 = memref.load %arg3[%c43] : memref<50xf32, #tpu.memory_space<smem>>
    %366 = vector.broadcast %365 : f32 to vector<256xf32>
    %367 = arith.mulf %364, %366 : vector<256xf32>
    %368 = arith.addf %362, %367 : vector<256xf32>
    %c0_182 = arith.constant 0 : index
    %c1_183 = arith.constant 1 : index
    %c67_184 = arith.constant 67 : index
    %369 = vector.load %arg8[%c0_182, %c1_183, %c67_184] : memref<1x2x328xf32, #tpu.memory_space<vmem>>, vector<1x1x256xf32>
    %370 = vector.shape_cast %369 : vector<1x1x256xf32> to vector<256xf32>
    %c48_185 = arith.constant 48 : index
    %371 = memref.load %arg3[%c48_185] : memref<50xf32, #tpu.memory_space<smem>>
    %372 = vector.broadcast %371 : f32 to vector<256xf32>
    %373 = arith.mulf %370, %372 : vector<256xf32>
    %374 = arith.addf %368, %373 : vector<256xf32>
    %375 = arith.mulf %374, %5 : vector<256xf32>
    %376 = arith.addf %345, %375 : vector<256xf32>
    %c0_186 = arith.constant 0 : index
    %c1_187 = arith.constant 1 : index
    %c4_188 = arith.constant 4 : index
    %377 = vector.load %arg8[%c0_186, %c1_187, %c4_188] : memref<1x2x328xf32, #tpu.memory_space<vmem>>, vector<1x1x256xf32>
    %378 = vector.shape_cast %377 : vector<1x1x256xf32> to vector<256xf32>
    %c29 = arith.constant 29 : index
    %379 = memref.load %arg3[%c29] : memref<50xf32, #tpu.memory_space<smem>>
    %380 = vector.broadcast %379 : f32 to vector<256xf32>
    %381 = arith.mulf %378, %380 : vector<256xf32>
    %c0_189 = arith.constant 0 : index
    %c1_190 = arith.constant 1 : index
    %c20_191 = arith.constant 20 : index
    %382 = vector.load %arg8[%c0_189, %c1_190, %c20_191] : memref<1x2x328xf32, #tpu.memory_space<vmem>>, vector<1x1x256xf32>
    %383 = vector.shape_cast %382 : vector<1x1x256xf32> to vector<256xf32>
    %c34_192 = arith.constant 34 : index
    %384 = memref.load %arg3[%c34_192] : memref<50xf32, #tpu.memory_space<smem>>
    %385 = vector.broadcast %384 : f32 to vector<256xf32>
    %386 = arith.mulf %383, %385 : vector<256xf32>
    %387 = arith.addf %381, %386 : vector<256xf32>
    %c0_193 = arith.constant 0 : index
    %c1_194 = arith.constant 1 : index
    %c36_195 = arith.constant 36 : index
    %388 = vector.load %arg8[%c0_193, %c1_194, %c36_195] : memref<1x2x328xf32, #tpu.memory_space<vmem>>, vector<1x1x256xf32>
    %389 = vector.shape_cast %388 : vector<1x1x256xf32> to vector<256xf32>
    %c39 = arith.constant 39 : index
    %390 = memref.load %arg3[%c39] : memref<50xf32, #tpu.memory_space<smem>>
    %391 = vector.broadcast %390 : f32 to vector<256xf32>
    %392 = arith.mulf %389, %391 : vector<256xf32>
    %393 = arith.addf %387, %392 : vector<256xf32>
    %c0_196 = arith.constant 0 : index
    %c1_197 = arith.constant 1 : index
    %c52_198 = arith.constant 52 : index
    %394 = vector.load %arg8[%c0_196, %c1_197, %c52_198] : memref<1x2x328xf32, #tpu.memory_space<vmem>>, vector<1x1x256xf32>
    %395 = vector.shape_cast %394 : vector<1x1x256xf32> to vector<256xf32>
    %c44 = arith.constant 44 : index
    %396 = memref.load %arg3[%c44] : memref<50xf32, #tpu.memory_space<smem>>
    %397 = vector.broadcast %396 : f32 to vector<256xf32>
    %398 = arith.mulf %395, %397 : vector<256xf32>
    %399 = arith.addf %393, %398 : vector<256xf32>
    %c0_199 = arith.constant 0 : index
    %c1_200 = arith.constant 1 : index
    %c68_201 = arith.constant 68 : index
    %400 = vector.load %arg8[%c0_199, %c1_200, %c68_201] : memref<1x2x328xf32, #tpu.memory_space<vmem>>, vector<1x1x256xf32>
    %401 = vector.shape_cast %400 : vector<1x1x256xf32> to vector<256xf32>
    %c49_202 = arith.constant 49 : index
    %402 = memref.load %arg3[%c49_202] : memref<50xf32, #tpu.memory_space<smem>>
    %403 = vector.broadcast %402 : f32 to vector<256xf32>
    %404 = arith.mulf %401, %403 : vector<256xf32>
    %405 = arith.addf %399, %404 : vector<256xf32>
    %406 = arith.mulf %405, %7 : vector<256xf32>
    %407 = arith.addf %376, %406 : vector<256xf32>
    %c1_203 = arith.constant 1 : index
    %408 = memref.load %arg4[%c1_203] : memref<2xf32, #tpu.memory_space<smem>>
    %409 = vector.broadcast %408 : f32 to vector<256xf32>
    %410 = arith.addf %407, %409 : vector<256xf32>
    %411 = arith.negf %410 : vector<256xf32>
    %412 = math.exp %411 : vector<256xf32>
    %cst_204 = arith.constant 1.000000e+00 : f32
    %413 = vector.broadcast %cst_204 : f32 to vector<256xf32>
    %414 = arith.addf %413, %412 : vector<256xf32>
    %415 = arith.divf %413, %414 : vector<256xf32>
    %416 = arith.mulf %410, %415 : vector<256xf32>
    %c0_205 = arith.constant 0 : index
    %c3_206 = arith.constant 3 : index
    %c0_207 = arith.constant 0 : index
    %417 = vector.load %arg7[%c0_205, %c3_206, %c0_207] : memref<1x4x256xf32, #tpu.memory_space<vmem>>, vector<1x1x256xf32>
    %418 = vector.shape_cast %417 : vector<1x1x256xf32> to vector<256xf32>
    %419 = vector.shape_cast %416 : vector<256xf32> to vector<1x1x256xf32>
    tpu.vector_store %arg7[%c0_205, %c3_206, %c0_207], %419 {strides = array<i32>} : memref<1x4x256xf32, #tpu.memory_space<vmem>>, vector<1x1x256xf32>,
    return
  }
  func.func @transform_0(%arg0: i32) -> i32 {
    %c0_i32 = arith.constant 0 : i32
    %c0_i32_0 = arith.constant 0 : i32
    return %c0_i32 : i32
  }
  func.func @transform_1(%arg0: i32) -> i32 {
    %c0_i32 = arith.constant 0 : i32
    %c0_i32_0 = arith.constant 0 : i32
    return %c0_i32 : i32
  }
  func.func @transform_2(%arg0: i32) -> i32 {
    %c0_i32 = arith.constant 0 : i32
    %c0_i32_0 = arith.constant 0 : i32
    return %c0_i32 : i32
  }
  func.func @transform_3(%arg0: i32) -> i32 {
    %c0_i32 = arith.constant 0 : i32
    %c0_i32_0 = arith.constant 0 : i32
    return %c0_i32 : i32
  }
  func.func @transform_4(%arg0: i32) -> (i32, i32) {
    %c0_i32 = arith.constant 0 : i32
    %c0_i32_0 = arith.constant 0 : i32
    %c0_i32_1 = arith.constant 0 : i32
    return %c0_i32, %c0_i32_0 : i32, i32
  }
  func.func @transform_5(%arg0: i32) -> (i32, i32, i32) {
    %c0_i32 = arith.constant 0 : i32
    %c0_i32_0 = arith.constant 0 : i32
    %c0_i32_1 = arith.constant 0 : i32
    return %arg0, %c0_i32, %c0_i32_0 : i32, i32, i32
  }
  func.func @transform_6(%arg0: i32) -> (i32, i32, i32) {
    %c0_i32 = arith.constant 0 : i32
    %c0_i32_0 = arith.constant 0 : i32
    %c0_i32_1 = arith.constant 0 : i32
    return %arg0, %c0_i32, %c0_i32_0 : i32, i32, i32
  }
}

</mosaic_0001>

<bundles_post_ra>
// kernel: tpu_custom_call.1
= control target key start
LH: loop header
LB: loop body
LE: loop exit
PB: predicated region body
PF: predicated region fallthrough
CT: control target
= control target key end

     0   :  { %s2046_s0 = inlined_call_operand.hbm [shape: f32[8], index: 0, kind: input, shape index: {}]   ;;  %s2047_s1 = inlined_call_operand.vmem [shape: f32[2], index: 1, kind: input, shape index: {}]   ;;  %s2048_s2 = inlined_call_operand.vmem [shape: f32[50], index: 2, kind: input, shape index: {}]   ;;  %s2049_s3 = inlined_call_operand.vmem [shape: f32[2], index: 3, kind: input, shape index: {}]   ;;  %s2050_s4 = inlined_call_operand.hbm [shape: f32[5,256], index: 4, kind: input, shape index: {}]   ;;  %s2051_s5 = inlined_call_operand.hbm [shape: f32[2,4,256], index: 5, kind: input, shape index: {}]   ;;  %s2052_s6 = inlined_call_operand.hbm [shape: f32[2,4,256], index: 6, kind: output, shape index: {}]  }
   0x1   :  { %2057 = sst [smem:[#allocation22_spill]] %s2046_s0 }
   0x2   :  { %11 = vsyncpa [#allocation6], 0 }
   0x3   :  { %12 = vsyncpa [#allocation7], 0 }
   0x4   :  { %13 = vsyncpa [#allocation10], 0 }
   0x5   :  { %14 = vsyncpa [#allocation4], 0 }
   0x6   :  { %15 = vsyncpa [#allocation14], 0 }
   0x7   :  { %17 = vsyncpa [#allocation14 + $0x1], 0 }
   0x8   :  { %18 = vsyncpa [#allocation5], 0 }
   0x9   :  { %20 = vsyncpa [#allocation5 + $0x1], 0  ;;  %s1585_s21 = smov 0   ;;  %s1587_s22 = smov 0  }
   0xa   :  { %s1589_s23 = smov 0   ;;  %s1591_s24 = smov 0  }
   0xb LB: > { %s221_s27 = sshll.u32 %s2048_s2, 4  ;;  %s1609_s28 = sadd.s32 4294967295, %s1528_s24   ;;  %s1528_s24 = sphi %s1591_s24, %s2086_s24   ;;  %s1524_s23 = sphi %s1589_s23, %s2085_s23   ;;  %s1520_s22 = sphi %s1587_s22, %s2084_s22   ;;  %s1516_s21 = sphi %s1585_s21, %s2083_s21   ;;  %s222_s27 = int_to_ptr.vmem [resolvable:$true] %s221_s27 }
   0xc   : > { %p1119_p0 = scmp.ge.s32.totalorder %s1528_s24, 1  ;;  %p2053_p1 = scmp.eq.s32.totalorder %s1609_s28, 0 }
   0xd   : > { %p188_p2 = scmp.lt.s32.totalorder %s1528_s24, 3  ;;  %s210_s8 = sshll.u32 %s2047_s1, 4  ;;  %s1624_s8 = int_to_ptr.vmem [resolvable:$true] %s210_s8 }
   0xe   : > { %s232_s11 = sshll.u32 %s2049_s3, 4  ;;  %s1530_s13 = smov [#allocation12]   ;;  %s1635_s11 = int_to_ptr.vmem [resolvable:$true] %s232_s11 }
   0xf   : > { %p1614_p3 = pnand %p1119_p0, %p188_p2  ;;  %s1637_s14 = sshll.u32 %s1530_s13, 4  ;;  %s244_s14 = int_to_ptr.vmem [resolvable:$true] %s1637_s14 }
  0x10   : > { %s1338_s15 = scalar_lea.vmem %s222_s27, 16  ;;  %p1346_p11 = scmp.lt.s32.totalorder %s222_s27, %s222_s27 }
  0x11   : > { %s2058_s29 = scalar_select %p1614_p3, 1, 0 }
  0x12   : > { %p1236_p5 = pneg %p1614_p3  ;;  %p1339_p7 = scmp.ne.s32.totalorder %s222_s27, %s1338_s15 }
  0x13   : > { %p1347_p12 = scmp.lt.s32.totalorder %s1338_s15, %s1338_s15 }
  0x14   : > { %p1631_p6 = pnand %p1236_p5, %p2053_p1 }
  0x15   : > { %p1348_p13 = por %p1347_p12, %p1346_p11 }
  0x16   : > { %p1340_p8 = pneg %p1631_p6 }
  0x18   : > { %p1341_p9 = pnand %p1340_p8, %p1339_p7 }
  0x1a   : > { %p1342_p10 = pneg %p1341_p9 }
  0x1c   : > { %p1349_p0 = pnand %p1348_p13, %p1342_p10 }
  0x1e   : > { %1352 = shalt.err (!%p1349_p0)
}
  0x1f   : > { %s1531_s16 = smov [#allocation9]   ;;  %s1532_s17 = smov [#allocation3]  }
  0x20   : > { %1245 = dma.vmem_to_smem (!%p1631_p6), %s222_s27, 16, %s1531_s16, [#allocation10]  }
  0x21   : > { %s2060_s0 = sld [smem:[#allocation22_spill]]  ;;  %s1364_s20 = scalar_lea.vmem %s1624_s8, 16 }
  0x22   : > { %p1365_p2 = scmp.ne.s32.totalorder %s1624_s8, %s1364_s20  ;;  %p1372_p9 = scmp.lt.s32.totalorder %s1624_s8, %s1624_s8 }
  0x23   : > { %p1373_p10 = scmp.lt.s32.totalorder %s1364_s20, %s1364_s20 }
  0x24   : > { %p1367_p5 = pnand %p1365_p2, %p1340_p8 }
  0x25   : > { %p1374_p11 = por %p1373_p10, %p1372_p9 }
  0x26   : > { %p1368_p7 = pneg %p1367_p5 }
  0x27   : > { %1239 = dma.hbm_to_smem (!%p1631_p6), %s2060_s0, 16, %s1532_s17, [#allocation6]  }
  0x28   : > { %p1375_p12 = pnand %p1374_p11, %p1368_p7 }
  0x2a   : > { %1378 = shalt.err (!%p1375_p12)
}
  0x2b   : > { %s1533_s25 = smov [#allocation8]   ;;  %s1379_s26 = scalar_lea.vmem %s1635_s11, 16 }
  0x2c   : > { %1242 = dma.vmem_to_smem (!%p1631_p6), %s1624_s8, 16, %s1533_s25, [#allocation7]  }
  0x2d   : > { %p1380_p13 = scmp.ne.s32.totalorder %s1635_s11, %s1379_s26  ;;  %p1387_p5 = scmp.lt.s32.totalorder %s1635_s11, %s1635_s11 }
  0x2e   : > { %p1388_p9 = scmp.lt.s32.totalorder %s1379_s26, %s1379_s26 }
  0x2f   : > { %p1382_p0 = pnand %p1380_p13, %p1340_p8 }
  0x30   : > { %p1389_p7 = por %p1388_p9, %p1387_p5 }
  0x31   : > { %p1383_p2 = pneg %p1382_p0 }
  0x33   : > { %p1390_p10 = pnand %p1389_p7, %p1383_p2 }
  0x35   : > { %1393 = shalt.err (!%p1390_p10)
}
  0x36   : > { %s1534_s27 = smov [#allocation11]   ;;  %s1405_s30 = scalar_lea.vmem %s244_s14, 256 }
  0x37   : > { %1248 = dma.vmem_to_smem (!%p1631_p6), %s1635_s11, 16, %s1534_s27, [#allocation10]  }
  0x38   : > { %p1406_p11 = scmp.ne.s32.totalorder %s244_s14, %s1405_s30  ;;  %p1413_p0 = scmp.lt.s32.totalorder %s244_s14, %s244_s14 }
  0x39   : > { %p1414_p4 = scmp.lt.s32.totalorder %s1405_s30, %s1405_s30 }
  0x3a   : > { %p1408_p12 = pnand %p1406_p11, %p1340_p8 }
  0x3b   : > { %p1415_p1 = por %p1414_p4, %p1413_p0 }
  0x3c   : > { %p1409_p13 = pneg %p1408_p12 }
  0x3e   : > { %p1416_p5 = pnand %p1415_p1, %p1409_p13 }
  0x40   : > { %1419 = shalt.err (!%p1416_p5)
}
  0x41   : > { %1251 = dma.hbm_to_vmem [thread:$0]  (!%p1631_p6), %s2050_s4, 256, %s244_s14, [#allocation4]  }
  0x42   : > { %s1118_s9 = sadd.s32 4294967294, %s1528_s24   ;;  %s1682_s10 = sadd.s32 1, %s1528_s24  }
  0x43   : > { %s138_s11 = sadd.s32 1, %s1524_s23  ;;  %s135_s12 = ssub.s32 %s1528_s24, %s1682_s10 }
  0x44   : > { %p145_p1 = scmp.ne.s32.totalorder %s1524_s23, %s1520_s22  ;;  %p136_p4 = scmp.eq.s32.totalorder %s135_s12, 0 }
  0x45   : > { %p146_p8 = scmp.eq.s32.totalorder %s1528_s24, 0  ;;  %p151_p2 = scmp.ne.s32.totalorder %s1520_s22, %s1516_s21 }
  0x46   : > { %p175_p9 = scmp.eq.s32.totalorder %s1609_s28, 1  ;;  %p2061_p10 = scmp.eq.s32.totalorder %s1609_s28, 0 }
  0x47   : > { %s1694_s13 = scalar_select %p136_p4, %s1524_s23, %s138_s11  }
  0x48   : > { %p147_p7 = por %p146_p8, %p145_p1  ;;  %p1698_p11 = por %p2061_p10, %p151_p2 }
  0x49   : > { %p1702_p6 = por %p175_p9, %p145_p1  ;;  %p181_p12 = scmp.eq.s32.totalorder %s1118_s9, 1 }
  0x4a   : > { %s2062_s15 = scalar_select %p1698_p11, 1, 0 }
  0x4b   : > { %s2063_s14 = scalar_select %p1702_p6, 1, 0 }
  0x4c   : > { %p1265_p13 = scmp.lt.s32.totalorder %s1528_s24, 2  ;;  %s254_s16 = sand.u32 1, %s1524_s23  }
  0x4d   : > { %p1708_p0 = por %p181_p12, %p151_p2  ;;  %s1126_s18 = sshll.u32 %s254_s16, 3 }
  0x4e   : > { %s1210_s19 = sshll.u32 %s1528_s24, 7  ;;  %s258_s27 = scalar_lea.vmem [#allocation13], %s1126_s18 }
  0x4f   : > { %s2064_s17 = scalar_select %p1708_p0, 1, 0 }
  0x50   : > { %s1716_s26 = scalar_lea.hbm %s2051_s5, %s1210_s19  ;;  %s266_s30 = sshll.u32 %s258_s27, 4  ;;  %s267_s30 = int_to_ptr.vmem [resolvable:$true] %s266_s30 }
  0x51   : > { %p1718_p5 = pnand %p1265_p13, %p147_p7  ;;  %s255_s8 = scalar_lea.sflag [#allocation14], %s254_s16 }
  0x52   : > { %s1420_s9 = scalar_lea.hbm %s1716_s26, 128  ;;  %s1425_s19 = scalar_lea.hbm %s2051_s5, 256 }
  0x53   : > { %p1421_p1 = scmp.ne.s32.totalorder %s1716_s26, %s1420_s9  ;;  %p1422_p4 = pneg %p1718_p5 }
  0x54   : > { %p1426_p9 = scmp.lt.s32.totalorder %s1716_s26, %s2051_s5  ;;  %p1427_p7 = scmp.lt.s32.totalorder %s1425_s19, %s1420_s9 }
  0x55   : > { %p1423_p8 = pnand %p1422_p4, %p1421_p1 }
  0x56   : > { %p1428_p10 = por %p1427_p7, %p1426_p9 }
  0x57   : > { %p1424_p2 = pneg %p1423_p8 }
  0x59   : > { %p1429_p12 = pnand %p1428_p10, %p1424_p2 }
  0x5b   : > { %1432 = shalt.err (!%p1429_p12)
}
  0x5c   : > { %s1433_s25 = scalar_lea.vmem %s267_s30, 128  ;;  %s1535_s16 = smov [#allocation13]  }
  0x5d   : > { %p1434_p13 = scmp.ne.s32.totalorder %s267_s30, %s1433_s25  ;;  %s1438_s27 = sshll.u32 %s1535_s16, 4  ;;  %s1439_s27 = int_to_ptr.vmem [resolvable:$false] %s1438_s27 }
  0x5e   : > { %s1440_s0 = scalar_lea.vmem %s1439_s27, 256  ;;  %p1441_p1 = scmp.lt.s32.totalorder %s267_s30, %s1439_s27 }
  0x5f   : > { %p1436_p0 = pnand %p1434_p13, %p1422_p4  ;;  %p1442_p8 = scmp.lt.s32.totalorder %s1440_s0, %s1433_s25 }
  0x61   : > { %p1437_p6 = pneg %p1436_p0  ;;  %p1443_p11 = por %p1442_p8, %p1441_p1 }
  0x63   : > { %p1444_p3 = pnand %p1443_p11, %p1437_p6 }
  0x65   : > { %1447 = shalt.err (!%p1444_p3)
}
  0x66   : > { %1255 = dma.hbm_to_vmem [thread:$0]  (!%p1718_p5), %s1716_s26, 128, %s267_s30, %s255_s8  }
  0x67   : > { %p2066_p2 = scmp.ne.s32.totalorder %s2058_s29, 0 }
  0x68   : > { %p2067_p9 = scmp.eq.s32.totalorder (!%p2066_p2), %s1609_s28, 0 }
  0x69   : > { %275 = sbr.rel (%p2066_p2) target bundleno = 663 (0x297), region = 44 }
  0x6e   : > { %1491 = dma.done.wait (%p2067_p9), [#allocation6], 16   ;;  %p2068_p0 = pmov %p2067_p9 }
  0x70   : > { %1493 = vsyncadd (%p2068_p0), [#allocation6], 4294967280  ;;  %p2069_p4 = pmov %p2068_p0 }
  0x71   : > { %p2070_p7 = pmov %p2068_p0 }
  0x72   : > { %1495 = dma.done.wait (%p2069_p4), [#allocation7], 16  }
  0x73   : > { %1497 = vsyncadd (%p2070_p7), [#allocation7], 4294967280  ;;  %p2071_p3 = pmov %p2068_p0 }
  0x74   : > { %p2072_p11 = pmov %p2068_p0 }
  0x75   : > { %1499 = dma.done.wait (%p2071_p3), [#allocation10], 32  }
  0x76   : > { %1501 = vsyncadd (%p2072_p11), [#allocation10], 4294967264  ;;  %p2073_p6 = pmov %p2068_p0 }
  0x77   : > { %p2074_p5 = pmov %p2068_p0 }
  0x78   : > { %1503 = dma.done.wait (%p2073_p6), [#allocation4], 256  }
  0x79   : > { %1505 = vsyncadd (%p2074_p5), [#allocation4], 4294967040  ;;  %s1755_s0 = sand.u32 1, %s1520_s22   ;;  %p2075_p10 = scmp.ne.s32.totalorder %s2062_s15, 0 }
  0x7a   : > { %s1135_s29 = sshll.u32 %s1755_s0, 3  ;;  %s298_s26 = scalar_lea.sflag [#allocation14], %s1755_s0 }
  0x7b   : > { %s301_s30 = scalar_lea.vmem [#allocation13], %s1135_s29 }
  0x7c   : > { %1507 = dma.done.wait (%p2075_p10), %s298_s26, 128  }
  0x7d   : > { %1509 = vsyncadd (%p2075_p10), %s298_s26, 4294967168 }
  0x7e   : > { %306 = sfence }
  0x7f   : > { %s345_s7 = sld [smem:[#allocation3]]  ;;  %vm375_vm0 = vcmask 270336   ;;  %v1536_v0 = vmov 0.0   ;;  %vm377_vm1 = vcmask 581904   ;;  %s1537_s16 = smov 3   ;;  %v370_v39 = vlaneseq }
  0x80   : > { %s1140_s8 = sld [smem:[#allocation3 + $0x1]]  ;;  %376 = vst.msk [vmem:[#allocation2] sm:$0x1] %vm375_vm0, %v1536_v0  ;;  %417 = vst.msk [vmem:[#allocation2 + $0x1] sm:$0x1] %vm375_vm0, %v1536_v0  ;;  %s1538_s27 = smov 34  }
  0x81   : > { %s1141_s9 = sld [smem:[#allocation3 + $0x2]]  ;;  %378 = vst.msk [vmem:[#allocation2 + $0x4] sm:$0x1] %vm377_vm1, %v1536_v0  ;;  %418 = vst.msk [vmem:[#allocation2 + $0x5] sm:$0x1] %vm377_vm1, %v1536_v0  ;;  %vm1765_vm2 = vcmp.lt.s32.totalorder %v370_v39, 256 }
  0x82   : > { %s1142_s11 = sld [smem:[#allocation3 + $0x3]]  ;;  %v338_v1 = vld [vmem:[%s301_s30] ss:$4 sm:$0x3]  ;;  %s1771_s26 = scalar_lea.vmem [#allocation15], %s1135_s29  ;;  %vm1779_vm3 = vcmp.ge.s32.totalorder %v370_v39, 34 }
  0x83   : > { %s360_s12 = sld [smem:[#allocation8]]  ;;  %v1137_v2 = vld [vmem:[%s301_s30 + $0x1] ss:$4 sm:$0x3]  ;;  %vm387_vm4 = vcmp.lt.s32.totalorder %v370_v39, 290  ;;  %vm383_vm5 = vcmask 277504  }
  0x84   : > { %s1144_s19 = sld [smem:[#allocation3 + $0x4]]  ;;  %v1138_v3 = vld [vmem:[%s301_s30 + $0x2] ss:$4 sm:$0x3]  ;;  %vm388_vm6 = vmand %vm1779_vm3, %vm387_vm4  ;;  %vm634_vm7 = vcmask 23552   ;;  %vm439_vm8 = vcmask 916480  }
  0x85   : > { %v346_v4 = vstv %s345_s7  ;;  %s1145_s15 = sld [smem:[#allocation3 + $0x5]]  ;;  %v1139_v5 = vld [vmem:[%s301_s30 + $0x3] ss:$4 sm:$0x3]  ;;  %s1539_s30 = smov 1   ;;  %vm450_vm9 = vcmask 785408  }
  0x86   : > { %v347_v6 = vmul.f32 %v346_v4, %v338_v1  ;;  %v349_v7 = vstv %s1140_s8  ;;  %s1146_s20 = sld [smem:[#allocation3 + $0x6]]  ;;  %v335_v37 = vld [vmem:[#allocation12 + $0x3] ss:$8 sm:$0x3]  ;;  %vm461_vm10 = vcmask 654336   ;;  %vm472_vm11 = vcmask 523264  }
  0x87   : > { %v350_v8 = vmul.f32 %v1137_v2, %v349_v7  ;;  %v353_v9 = vstv %s1141_s9  ;;  %s1147_s18 = sld [smem:[#allocation3 + $0x7]]  ;;  %631 = vrot.lane.b32.xlu1 %v335_v37, %s1537_s16  ;;  %v333_v44 = vld [vmem:[#allocation12 + $0x1] ss:$8 sm:$0x3]  ;;  %s1542_s16 = smov 80   ;;  %vm524_vm12 = vcmask 7168  }
  0x88   : > { %v354_v10 = vmul.f32 %v1138_v3, %v353_v9  ;;  %v357_v11 = vstv %s1142_s11  ;;  %s1148_s25 = sld [smem:[#allocation8 + $0x1]]  ;;  %vm693_vm13 = vcmask 31744   ;;  %vm532_vm14 = vcmask 1039360   ;;  %p2080_p13 = scmp.ne.s32.totalorder %s2063_s14, 0 }
  0x89   : > { %v351_v12 = vadd.f32 %v350_v8, %v347_v6  ;;  %v358_v13 = vmul.f32 %v1139_v5, %v357_v11  ;;  %v361_v18 = vstv %s360_s12  ;;  %s1156_s29 = sld [smem:[#allocation9 + $0x6]]  ;;  %vm583_vm15 = vcmask 1031168  }
  0x8a   : > { %v391_v14 = vstv %s1144_s19  ;;  %s1157_s7 = sld [smem:[#allocation9 + $0xb]]  ;;  %vm642_vm0 = vcmask 1022976   ;;  %vm701_vm1 = vcmask 1014784  }
  0x8b   : > { %v355_v15 = vadd.f32 %v354_v10, %v351_v12  ;;  %v392_v16 = vmul.f32 %v391_v14, %v338_v1  ;;  %v394_v17 = vstv %s1145_s15  ;;  %s1158_s8 = sld [smem:[#allocation9 + $0x10]]  ;;  %s1540_s15 = smov 112  }
  0x8c   : > { %v395_v19 = vmul.f32 %v1137_v2, %v394_v17  ;;  %v398_v20 = vstv %s1146_s20  ;;  %s1183_s9 = sld [smem:[#allocation9 + $0x1f]]  ;;  %s1541_s20 = smov 96  }
  0x8d   : > { %v359_v21 = vadd.f32 %v358_v13, %v355_v15  ;;  %v399_v22 = vmul.f32 %v1138_v3, %v398_v20  ;;  %v402_v23 = vstv %s1147_s18  ;;  %s1166_s11 = sld [smem:[#allocation9 + $0x8]] }
  0x8e   : > { %v403_v24 = vmul.f32 %v1139_v5, %v402_v23  ;;  %v396_v25 = vadd.f32 %v395_v19, %v392_v16  ;;  %v406_v29 = vstv %s1148_s25  ;;  %s1184_s12 = sld [smem:[#allocation9 + $0x24]] }
  0x8f   : > { %v362_v26 = vadd.f32 %v361_v18, %v359_v21  ;;  %v481_v52 = vstv %s1156_s29  ;;  %s1188_s19 = sld [smem:[#allocation9 + $0x20]] }
  0x90   : > { %v400_v27 = vadd.f32 %v399_v22, %v396_v25  ;;  %v491_v53 = vstv %s1157_s7  ;;  %s1161_s18 = sld [smem:[#allocation9 + $0x7]] }
  0x91   : > { %v1143_v28 = vmul.f32 -1.442695, %v362_v26  ;;  %v501_v57 = vstv %s1158_s8  ;;  %s1159_s25 = sld [smem:[#allocation9 + $0x15]] }
  0x92   : > { %v404_v30 = vadd.f32 %v403_v24, %v400_v27  ;;  %v767_v58 = vstv %s1183_s9  ;;  %s1193_s29 = sld [smem:[#allocation9 + $0x21]] }
  0x93   : > { %1322 = vpow2.f32 %v1143_v28  ;;  %v591_v62 = vstv %s1166_s11  ;;  %s1186_s7 = sld [smem:[#allocation9 + $0x2e]]  ;;  %s1543_s11 = smov 64  }
  0x94   : > { %v407_v31 = vadd.f32 %v406_v29, %v404_v30  ;;  %v777_v63 = vstv %s1184_s12  ;;  %s1162_s8 = sld [smem:[#allocation9 + $0xc]] }
  0x95   : > { %v818_v2 = vstv %s1188_s19  ;;  %s1194_s9 = sld [smem:[#allocation9 + $0x26]] }
  0x96   : > { %v1149_v32 = vmul.f32 -1.442695, %v407_v31  ;;  %v540_v3 = vstv %s1161_s18  ;;  %s1171_s12 = sld [smem:[#allocation9 + $0x9]] }
  0x97   : > { %v511_v6 = vstv %s1159_s25  ;;  %s1168_s19 = sld [smem:[#allocation9 + $0x12]] }
  0x98   : > { %1324 = vpow2.f32 %v1149_v32  ;;  %v868_v11 = vstv %s1193_s29  ;;  %s1189_s18 = sld [smem:[#allocation9 + $0x25]] }
  0x99   : > { %v797_v14 = vstv %s1186_s7  ;;  %s1190_s25 = sld [smem:[#allocation9 + $0x2a]] }
  0x9a   : > { %v550_v15 = vstv %s1162_s8  ;;  %s1163_s29 = sld [smem:[#allocation9 + $0x11]] }
  0x9b   : > { %v878_v18 = vstv %s1194_s9  ;;  %s1169_s7 = sld [smem:[#allocation9 + $0x17]] }
  0x9c   : > { %v650_v19 = vstv %s1171_s12  ;;  %s1172_s8 = sld [smem:[#allocation9 + $0xe]] }
  0x9d   : > { %v611_v22 = vstv %s1168_s19  ;;  %s1191_s9 = sld [smem:[#allocation9 + $0x2f]] }
  0x9e   : > { %v828_v23 = vstv %s1189_s18  ;;  %s1195_s12 = sld [smem:[#allocation9 + $0x2b]] }
  0x9f   : > { %s1200_s19 = sld [smem:[#allocation9 + $0x2c]] }
  0xa0   : > { %v1323_v33 = vpop.eup %1322  ;;  %s1164_s18 = sld [smem:[#allocation9 + $0x16]] }
  0xa1   : > { %v366_v34 = vadd.f32 1.0, %v1323_v33 }
  0xa3   : > { %1326 = vrcp.f32 %v366_v34  ;;  %v621_v34 = vstv %s1169_s7  ;;  %s1201_s7 = sld [smem:[#allocation9 + $0x31]] }
  0xa4   : > { %v888_v39 = vstv %s1195_s12  ;;  %s1180_s12 = sld [smem:[#allocation9 + $0x28]] }
  0xa5   : > { %v1325_v35 = vpop.eup %1324 }
  0xa6   : > { %v411_v36 = vadd.f32 1.0, %v1325_v35  ;;  %v660_v35 = vstv %s1172_s8  ;;  %s1179_s8 = sld [smem:[#allocation9 + $0x23]] }
  0xa8   : > { %1328 = vrcp.f32 %v411_v36 }
  0xb0   : > { %v1327_v38 = vpop.eup %1326 }
  0xb1   : > { %v369_v40 = vmul.f32 %v1327_v38, %v362_v26  ;;  %v838_v26 = vstv %s1190_s25  ;;  %v848_v38 = vstv %s1191_s9  ;;  %s1174_s25 = sld [smem:[#allocation9 + $0x18]] }
  0xb2   : > { %s1151_s9 = sld [smem:[#allocation9 + $0x5]] }
  0xb3   : > { %380 = vrot.lane.b32.xlu0 %v369_v40, %s1538_s27  ;;  %374 = vst.msk [vmem:[%s1771_s26] ss:$4 sm:$0x3] %vm1765_vm2, %v369_v40 }
  0xb5   : > { %v1329_v42 = vpop.eup %1328 }
  0xb6   : > { %v414_v43 = vmul.f32 %v1329_v42, %v407_v31  ;;  %v560_v31 = vstv %s1163_s29  ;;  %s1178_s29 = sld [smem:[#allocation9 + $0x1e]] }
  0xb8   : > { %420 = vrot.lane.b32.xlu0 %v414_v43, %s1538_s27  ;;  %1150 = vst.msk [vmem:[%s1771_s26 + $0x2] ss:$4 sm:$0x3] %vm1765_vm2, %v414_v43  ;;  %s1185_s27 = sld [smem:[#allocation9 + $0x29]]  ;;  %v939_v43 = vstv %s1200_s19  ;;  %s1544_s19 = smov 4  }
  0xbc   : > { %521 = vrot.lane.b32.xlu0 %v333_v44, %s1539_s30  ;;  %s1167_s30 = sld [smem:[#allocation9 + $0xd]]  ;;  %v570_v44 = vstv %s1164_s18 }
  0xbd   : > { %s1152_s18 = sld [smem:[#allocation9 + $0xa]] }
  0xbe   : > { %v787_v7 = vstv %s1185_s27  ;;  %s1198_s27 = sld [smem:[#allocation9 + $0x22]] }
  0xc2   : > { %v601_v10 = vstv %s1167_s30  ;;  %s1199_s30 = sld [smem:[#allocation9 + $0x27]] }
  0xc4   : > { %v919_v27 = vstv %s1198_s27  ;;  %s1173_s27 = sld [smem:[#allocation9 + $0x13]] }
  0xc8   : > { %v929_v30 = vstv %s1199_s30  ;;  %s1196_s30 = sld [smem:[#allocation9 + $0x30]] }
 0x125   : > { %v381_v46 = vpop.permute.xlu0 %380 }
 0x126   : > { %v382_v47 = vrot.slane %v381_v46, 7 }
 0x128   : > { %v384_v48 = vsel %vm383_vm5, %v382_v47, %v381_v46  ;;  %v680_v47 = vstv %s1174_s25  ;;  %s1181_s25 = sld [smem:[#allocation9 + $0x2d]] }
 0x129   : > { %389 = vst.msk [vmem:[#allocation2] ss:$2 sm:$0x7] %vm388_vm6, %v384_v48  ;;  %v670_v48 = vstv %s1173_s27  ;;  %s1153_s27 = sld [smem:[#allocation9 + $0xf]] }
 0x12a   : > { %v421_v49 = vpop.permute.xlu0 %420 }
 0x12b   : > { %v422_v50 = vrot.slane %v421_v49, 7 }
 0x12d   : > { %v423_v51 = vsel %vm383_vm5, %v422_v50, %v421_v49 }
 0x12e   : > { %426 = vst.msk [vmem:[#allocation2 + $0x1] ss:$2 sm:$0x7] %vm388_vm6, %v423_v51  ;;  %v898_v51 = vstv %s1196_s30  ;;  %s1154_s30 = sld [smem:[#allocation9 + $0x14]] }
 0x130   : > { %v1785_v54 = vld [vmem:[#allocation2] ss:$2 sm:$0x7] }
 0x131   : > { %v482_v55 = vmul.f32 %v481_v52, %v1785_v54  ;;  %v492_v56 = vmul.f32 %v491_v53, %v1785_v54  ;;  %v502_v60 = vmul.f32 %v501_v57, %v1785_v54  ;;  %v592_v0 = vmul.f32 %v591_v62, %v1785_v54  ;;  %v337_v52 = vld [vmem:[#allocation12 + $0x4] ss:$8 sm:$0x3] }
 0x132   : > { %v541_v5 = vmul.f32 %v540_v3, %v1785_v54  ;;  %v512_v8 = vmul.f32 %v511_v6, %v1785_v54  ;;  %v602_v12 = vmul.f32 %v601_v10, %v1785_v54  ;;  %v551_v17 = vmul.f32 %v550_v15, %v1785_v54  ;;  %v1869_v10 = vpop.permute.xlu0 %521 }
 0x133   : > { %484 = vrot.lane.b32.xlu1 %v482_v55, %s1540_s15  ;;  %494 = vrot.lane.b32.xlu0 %v492_v56, %s1541_s20  ;;  %v651_v21 = vmul.f32 %v650_v19, %v1785_v54  ;;  %v612_v24 = vmul.f32 %v611_v22, %v1785_v54  ;;  %v561_v33 = vmul.f32 %v560_v31, %v1785_v54  ;;  %v723_v55 = vstv %s1178_s29  ;;  %s1893_s29 = sld [smem:[#allocation9 + $0x1b]] }
 0x134   : > { %v622_v36 = vmul.f32 %v621_v34, %v1785_v54  ;;  %v661_v37 = vmul.f32 %v660_v35, %v1785_v54  ;;  %v571_v46 = vmul.f32 %v570_v44, %v1785_v54  ;;  %v681_v49 = vmul.f32 %v680_v47, %v1785_v54 }
 0x135   : > { %v1791_v59 = vld [vmem:[#allocation2 + $0x1] ss:$2 sm:$0x7]  ;;  %v671_v50 = vmul.f32 %v670_v48, %v1785_v54  ;;  %v949_v56 = vstv %s1201_s7  ;;  %s1895_s7 = sld [smem:[#allocation9 + $0x4]]  ;;  %v523_v44 = vrot.slane %v1869_v10, 7 }
 0x136   : > { %v768_v61 = vmul.f32 %v767_v58, %v1791_v59  ;;  %v778_v1 = vmul.f32 %v777_v63, %v1791_v59  ;;  %v819_v4 = vmul.f32 %v818_v2, %v1791_v59  ;;  %v788_v9 = vmul.f32 %v787_v7, %v1791_v59 }
 0x137   : > { %504 = vrot.lane.b32.xlu0 %v502_v60, %s1542_s16  ;;  %v869_v13 = vmul.f32 %v868_v11, %v1791_v59  ;;  %v798_v16 = vmul.f32 %v797_v14, %v1791_v59  ;;  %v879_v20 = vmul.f32 %v878_v18, %v1791_v59  ;;  %v829_v25 = vmul.f32 %v828_v23, %v1791_v59  ;;  %v632_v11 = vpop.permute.xlu1 %631 }
 0x138   : > { %770 = vrot.lane.b32.xlu1 %v768_v61, %s1540_s15  ;;  %v839_v28 = vmul.f32 %v838_v26, %v1791_v59  ;;  %v920_v29 = vmul.f32 %v919_v27, %v1791_v59  ;;  %v930_v32 = vmul.f32 %v929_v30, %v1791_v59  ;;  %v849_v40 = vmul.f32 %v848_v38, %v1791_v59 }
 0x139   : > { %v889_v42 = vmul.f32 %v888_v39, %v1791_v59  ;;  %v940_v45 = vmul.f32 %v939_v43, %v1791_v59  ;;  %v899_v53 = vmul.f32 %v898_v51, %v1791_v59  ;;  %v724_v57 = vmul.f32 %v723_v55, %v1791_v59 }
 0x13a   : > { %v950_v58 = vmul.f32 %v949_v56, %v1791_v59  ;;  %v733_v60 = vstv %s1179_s8  ;;  %v433_v61 = vstv %s1151_s9  ;;  %s1931_s8 = sld [smem:[#allocation9 + $0x1c]] }
 0x13b   : > { %594 = vrot.lane.b32.xlu0 %v592_v0, %s1540_s15  ;;  %v734_v62 = vmul.f32 %v733_v60, %v1791_v59  ;;  %v434_v63 = vmul.f32 %v433_v61, %v1785_v54  ;;  %v743_v0 = vstv %s1180_s12  ;;  %v647_v38 = vstv %s1895_s7  ;;  %s1948_s9 = sld [smem:[#allocation9 + $0x1d]]  ;;  %s1545_s12 = smov 126  }
 0x13c   : > { %780 = vrot.lane.b32.xlu1 %v778_v1, %s1541_s20  ;;  %v444_v1 = vstv %s1152_s18  ;;  %v744_v2 = vmul.f32 %v743_v0, %v1791_v59  ;;  %s1547_s18 = smov 125  }
 0x13d   : > { %v445_v3 = vmul.f32 %v444_v1, %v1785_v54 }
 0x13f   : > { %821 = vrot.lane.b32.xlu0 %v819_v4, %s1540_s15  ;;  %v753_v4 = vstv %s1181_s25  ;;  %s1548_s25 = smov 124  }
 0x140   : > { %543 = vrot.lane.b32.xlu1 %v541_v5, %s1540_s15  ;;  %v455_v5 = vstv %s1153_s27  ;;  %v754_v6 = vmul.f32 %v753_v4, %v1791_v59  ;;  %s428_s27 = sld [smem:[#allocation9]] }
 0x141   : > { %v456_v7 = vmul.f32 %v455_v5, %v1785_v54 }
 0x143   : > { %514 = vrot.lane.b32.xlu0 %v512_v8, %s1543_s11  ;;  %v466_v8 = vstv %s1154_s30  ;;  %s1177_s30 = sld [smem:[#allocation9 + $0x19]] }
 0x144   : > { %790 = vrot.lane.b32.xlu1 %v788_v9, %s1542_s16  ;;  %v467_v9 = vmul.f32 %v466_v8, %v1785_v54 }
 0x147   : > { %604 = vrot.lane.b32.xlu0 %v602_v12, %s1541_s20 }
 0x148   : > { %871 = vrot.lane.b32.xlu1 %v869_v13, %s1540_s15 }
 0x14b   : > { %800 = vrot.lane.b32.xlu0 %v798_v16, %s1543_s11 }
 0x14c   : > { %553 = vrot.lane.b32.xlu1 %v551_v17, %s1541_s20 }
 0x14f   : > { %881 = vrot.lane.b32.xlu0 %v879_v20, %s1541_s20 }
 0x150   : > { %653 = vrot.lane.b32.xlu1 %v651_v21, %s1540_s15 }
 0x153   : > { %614 = vrot.lane.b32.xlu0 %v612_v24, %s1542_s16 }
 0x154   : > { %831 = vrot.lane.b32.xlu1 %v829_v25, %s1541_s20 }
 0x157   : > { %841 = vrot.lane.b32.xlu0 %v839_v28, %s1542_s16 }
 0x158   : > { %922 = vrot.lane.b32.xlu1 %v920_v29, %s1540_s15  ;;  %v633_v29 = vrot.slane %v632_v11, 7 }
 0x15b   : > { %932 = vrot.lane.b32.xlu0 %v930_v32, %s1541_s20 }
 0x15c   : > { %563 = vrot.lane.b32.xlu1 %v561_v33, %s1542_s16 }
 0x15f   : > { %624 = vrot.lane.b32.xlu0 %v622_v36, %s1543_s11 }
 0x160   : > { %663 = vrot.lane.b32.xlu1 %v661_v37, %s1541_s20  ;;  %v815_v37 = vstv %s1893_s29 }
 0x163   : > { %851 = vrot.lane.b32.xlu0 %v849_v40, %s1543_s11  ;;  %v1906_v40 = vsel %vm634_vm7, %v633_v29, %v632_v11 }
 0x164   : > { %891 = vrot.lane.b32.xlu1 %v889_v42, %s1542_s16 }
 0x167   : > { %942 = vrot.lane.b32.xlu0 %v940_v45, %s1542_s16 }
 0x168   : > { %573 = vrot.lane.b32.xlu1 %v571_v46, %s1543_s11 }
 0x16b   : > { %683 = vrot.lane.b32.xlu0 %v681_v49, %s1543_s11 }
 0x16c   : > { %673 = vrot.lane.b32.xlu1 %v671_v50, %s1542_s16 }
 0x16f   : > { %690 = vrot.lane.b32.xlu0 %v337_v52, %s1544_s19  ;;  %s1546_s19 = smov 127  }
 0x170   : > { %901 = vrot.lane.b32.xlu1 %v899_v53, %s1543_s11 }
 0x173   : > { %726 = vrot.lane.b32.xlu0 %v724_v57, %s1540_s15 }
 0x174   : > { %952 = vrot.lane.b32.xlu1 %v950_v58, %s1543_s11  ;;  %v816_v58 = vmul.f32 %v815_v37, %v1791_v59 }
 0x177   : > { %736 = vrot.lane.b32.xlu0 %v734_v62, %s1541_s20 }
 0x178   : > { %436 = vrot.lane.b32.xlu1 %v434_v63, %s1540_s15  ;;  %s1155_s15 = sld [smem:[#allocation9 + $0x1]] }
 0x17b   : > { %746 = vrot.lane.b32.xlu0 %v744_v2, %s1542_s16 }
 0x17c   : > { %447 = vrot.lane.b32.xlu1 %v445_v3, %s1541_s20  ;;  %s1883_s20 = sld [smem:[#allocation9 + $0x1a]] }
 0x17e   : > { %v478_v31 = vstv %s1155_s15  ;;  %s705_s15 = sld [smem:[#allocation11]] }
 0x17f   : > { %756 = vrot.lane.b32.xlu0 %v754_v6, %s1543_s11  ;;  %v479_v45 = vmul.f32 %v478_v31, %v1785_v54 }
 0x180   : > { %458 = vrot.lane.b32.xlu1 %v456_v7, %s1542_s16  ;;  %s1887_s16 = sld [smem:[#allocation9 + $0x3]] }
 0x182   : > { %v764_v32 = vstv %s1883_s20  ;;  %s1202_s20 = sld [smem:[#allocation11 + $0x1]] }
 0x183   : > { %v765_v48 = vmul.f32 %v764_v32, %v1791_v59 }
 0x184   : > { %469 = vrot.lane.b32.xlu1 %v467_v9, %s1543_s11  ;;  %s1891_s11 = sld [smem:[#allocation9 + $0x2]] }
 0x186   : > { %v588_v33 = vstv %s1887_s16  ;;  %s1211_s16 = sshll.u32 %s1609_s28, 7  ;;  %s1549_s28 = smov [#allocation15]  }
 0x187   : > { %v589_v55 = vmul.f32 %v588_v33, %v1785_v54 }
 0x18a   : > { %v537_v35 = vstv %s1891_s11  ;;  %s993_s11 = sshll.u32 %s1771_s26, 4  ;;  %s994_s11 = int_to_ptr.vmem [resolvable:$true] %s993_s11 }
 0x18b   : > { %v538_v56 = vmul.f32 %v537_v35, %v1785_v54 }
 0x1a5   : > { %v485_v12 = vpop.permute.xlu1 %484  ;;  %v495_v13 = vpop.permute.xlu0 %494 }
 0x1a6   : > { %v486_v36 = vrot.slane %v485_v12, 1  ;;  %v496_v46 = vrot.slane %v495_v13, 1 }
 0x1a8   : > { %v487_v52 = vsel %vm439_vm8, %v485_v12, %v486_v36  ;;  %v497_v63 = vsel %vm450_vm9, %v495_v13, %v496_v46 }
 0x1a9   : > { %v1871_v14 = vpop.permute.xlu0 %504  ;;  %v489_v3 = vadd.f32 %v487_v52, %v479_v45 }
 0x1aa   : > { %v771_v15 = vpop.permute.xlu1 %770  ;;  %v506_v7 = vrot.slane %v1871_v14, 1 }
 0x1ab   : > { %v772_v47 = vrot.slane %v771_v15, 1  ;;  %v499_v32 = vadd.f32 %v497_v63, %v489_v3 }
 0x1ac   : > { %v507_v52 = vsel %vm461_vm10, %v1871_v14, %v506_v7  ;;  %v648_v14 = vmul.f32 %v647_v38, %v1785_v54 }
 0x1ad   : > { %v595_v16 = vpop.permute.xlu0 %594  ;;  %v773_v0 = vsel %vm439_vm8, %v771_v15, %v772_v47 }
 0x1ae   : > { %v1873_v17 = vpop.permute.xlu1 %780  ;;  %v596_v34 = vrot.slane %v595_v16, 1  ;;  %v775_v13 = vadd.f32 %v773_v0, %v765_v48  ;;  %v525_v0 = vsel %vm524_vm12, %v523_v44, %v1869_v10 }
 0x1af   : > { %v782_v53 = vrot.slane %v1873_v17, 1 }
 0x1b0   : > { %v597_v49 = vsel %vm439_vm8, %v595_v16, %v596_v34 }
 0x1b1   : > { %v822_v18 = vpop.permute.xlu0 %821  ;;  %v599_v1 = vadd.f32 %v597_v49, %v589_v55  ;;  %v783_v8 = vsel %vm450_vm9, %v1873_v17, %v782_v53 }
 0x1b2   : > { %v1875_v19 = vpop.permute.xlu1 %543  ;;  %v823_v50 = vrot.slane %v822_v18, 1  ;;  %v785_v33 = vadd.f32 %v783_v8, %v775_v13 }
 0x1b3   : > { %v545_v9 = vrot.slane %v1875_v19, 1 }
 0x1b4   : > { %v824_v4 = vsel %vm439_vm8, %v822_v18, %v823_v50 }
 0x1b5   : > { %v1877_v20 = vpop.permute.xlu0 %514  ;;  %v546_v36 = vsel %vm439_vm8, %v1875_v19, %v545_v9 }
 0x1b6   : > { %v1879_v21 = vpop.permute.xlu1 %790  ;;  %v516_v47 = vrot.slane %v1877_v20, 1  ;;  %v548_v53 = vadd.f32 %v546_v36, %v538_v56 }
 0x1b7   : > { %v792_v2 = vrot.slane %v1879_v21, 1 }
 0x1b8   : > { %v517_v3 = vsel %vm472_vm11, %v1877_v20, %v516_v47 }
 0x1b9   : > { %v605_v22 = vpop.permute.xlu0 %604  ;;  %v793_v29 = vsel %vm461_vm10, %v1879_v21, %v792_v2 }
 0x1ba   : > { %v1881_v23 = vpop.permute.xlu1 %871  ;;  %v606_v42 = vrot.slane %v605_v22, 1  ;;  %v795_v46 = vadd.f32 %v793_v29, %v785_v33 }
 0x1bc   : > { %v607_v60 = vsel %vm450_vm9, %v605_v22, %v606_v42 }
 0x1bd   : > { %v1885_v24 = vpop.permute.xlu0 %800  ;;  %v609_v11 = vadd.f32 %v607_v60, %v599_v1  ;;  %v865_v1 = vstv %s1931_s8  ;;  %s991_s8 = scalar_lea.hbm %s2052_s6, %s1211_s16 }
 0x1be   : > { %v1889_v25 = vpop.permute.xlu1 %553  ;;  %v802_v15 = vrot.slane %v1885_v24, 1 }
 0x1bf   : > { %v555_v31 = vrot.slane %v1889_v25, 1 }
 0x1c0   : > { %v803_v21 = vsel %vm472_vm11, %v1885_v24, %v802_v15  ;;  %v873_v24 = vrot.slane %v1881_v23, 1 }
 0x1c1   : > { %v1897_v26 = vpop.permute.xlu0 %881 }
 0x1c2   : > { %v1899_v27 = vpop.permute.xlu1 %653  ;;  %v874_v10 = vsel %vm439_vm8, %v1881_v23, %v873_v24  ;;  %v916_v23 = vstv %s1948_s9  ;;  %s979_s9 = scalar_lea.sflag [#allocation5], %s1755_s0 }
 0x1c3   : > { %v655_v50 = vrot.slane %v1899_v27, 1  ;;  %v917_v36 = vmul.f32 %v916_v23, %v1791_v59 }
 0x1c5   : > { %v615_v28 = vpop.permute.xlu0 %614 }
 0x1c6   : > { %v832_v30 = vpop.permute.xlu1 %831  ;;  %v616_v51 = vrot.slane %v615_v28, 1 }
 0x1c7   : > { %v833_v61 = vrot.slane %v832_v30, 1 }
 0x1c8   : > { %v617_v5 = vsel %vm461_vm10, %v615_v28, %v616_v51  ;;  %v826_v28 = vadd.f32 %v824_v4, %v816_v58  ;;  %v805_v58 = vadd.f32 %v803_v21, %v795_v46  ;;  %v883_v4 = vrot.slane %v1897_v26, 1 }
 0x1c9   : > { %v842_v39 = vpop.permute.xlu0 %841  ;;  %v834_v16 = vsel %vm450_vm9, %v832_v30, %v833_v61  ;;  %v619_v17 = vadd.f32 %v617_v5, %v609_v11  ;;  %v866_v11 = vmul.f32 %v865_v1, %v1791_v59 }
 0x1ca   : > { %v1908_v43 = vpop.permute.xlu1 %922  ;;  %v843_v6 = vrot.slane %v842_v39, 1  ;;  %v836_v37 = vadd.f32 %v834_v16, %v826_v28  ;;  %v884_v16 = vsel %vm450_vm9, %v1897_v26, %v883_v4 }
 0x1cb   : > { %v924_v44 = vrot.slane %v1908_v43, 1 }
 0x1cc   : > { %v844_v34 = vsel %vm461_vm10, %v842_v39, %v843_v6  ;;  %v556_v39 = vsel %vm450_vm9, %v1889_v25, %v555_v31  ;;  %v509_v6 = vadd.f32 %v507_v52, %v499_v32 }
 0x1cd   : > { %v1918_v57 = vpop.permute.xlu0 %932  ;;  %v846_v19 = vadd.f32 %v844_v34, %v836_v37  ;;  %v558_v2 = vadd.f32 %v556_v39, %v548_v53  ;;  %v925_v29 = vsel %vm439_vm8, %v1908_v43, %v924_v44  ;;  %v719_v44 = vstv %s1177_s30 }
 0x1ce   : > { %v564_v62 = vpop.permute.xlu1 %563  ;;  %v519_v9 = vadd.f32 %v517_v3, %v509_v6  ;;  %v927_v47 = vadd.f32 %v925_v29, %v917_v36 }
 0x1cf   : > { %v565_v30 = vrot.slane %v564_v62, 1 }
 0x1d1   : > { %v625_v12 = vpop.permute.xlu0 %624  ;;  %v566_v25 = vsel %vm461_vm10, %v564_v62, %v565_v30  ;;  %v656_v62 = vsel %vm439_vm8, %v1899_v27, %v655_v50  ;;  %v806_v27 = vmul.f32 %v805_v58, %v525_v0 }
 0x1d2   : > { %v664_v18 = vpop.permute.xlu1 %663  ;;  %v626_v22 = vrot.slane %v625_v12, 1  ;;  %v568_v54 = vadd.f32 %v566_v25, %v558_v2 }
 0x1d3   : > { %v665_v60 = vrot.slane %v664_v18, 1 }
 0x1d4   : > { %v627_v35 = vsel %vm472_vm11, %v625_v12, %v626_v22  ;;  %v658_v12 = vadd.f32 %v656_v62, %v648_v14  ;;  %v934_v22 = vrot.slane %v1918_v57, 1  ;;  %v429_v62 = vstv %s428_s27 }
 0x1d5   : > { %v629_v42 = vadd.f32 %v627_v35, %v619_v17  ;;  %v852_v45 = vpop.permute.xlu0 %851  ;;  %v666_v38 = vsel %vm450_vm9, %v664_v18, %v665_v60  ;;  %v876_v18 = vadd.f32 %v874_v10, %v866_v11  ;;  %v717_v10 = vld [vmem:[#allocation2 + $0x1] ss:$2 sm:$0x3] }
 0x1d6   : > { %v892_v48 = vpop.permute.xlu1 %891  ;;  %v853_v49 = vrot.slane %v852_v45, 1  ;;  %v668_v31 = vadd.f32 %v666_v38, %v658_v12 }
 0x1d7   : > { %v1951_v51 = vmul.f32 %v1906_v40, %v629_v42  ;;  %v893_v7 = vrot.slane %v892_v48, 1  ;;  %v886_v26 = vadd.f32 %v884_v16, %v876_v18  ;;  %v527_v42 = vmul.f32 %v525_v0, %v519_v9 }
 0x1d8   : > { %v854_v55 = vsel %vm472_vm11, %v852_v45, %v853_v49  ;;  %v935_v45 = vsel %vm450_vm9, %v1918_v57, %v934_v22 }
 0x1d9   : > { %v856_v61 = vadd.f32 %v854_v55, %v846_v19  ;;  %v943_v63 = vpop.permute.xlu0 %942  ;;  %v894_v17 = vsel %vm461_vm10, %v892_v48, %v893_v7  ;;  %v937_v50 = vadd.f32 %v935_v45, %v927_v47 }
 0x1da   : > { %v574_v56 = vpop.permute.xlu1 %573  ;;  %v944_v32 = vrot.slane %v943_v63, 1  ;;  %v896_v21 = vadd.f32 %v894_v17, %v886_v26 }
 0x1db   : > { %v575_v5 = vrot.slane %v574_v56, 1  ;;  %858 = vrot.lane.b32.xlu0 %v856_v61, %s1545_s12 }
 0x1dc   : > { %v945_v48 = vsel %vm461_vm10, %v943_v63, %v944_v32 }
 0x1dd   : > { %v576_v20 = vsel %vm472_vm11, %v574_v56, %v575_v5  ;;  %v684_v8 = vpop.permute.xlu0 %683  ;;  %v947_v55 = vadd.f32 %v945_v48, %v937_v50 }
 0x1de   : > { %v578_v13 = vadd.f32 %v576_v20, %v568_v54  ;;  %v674_v15 = vpop.permute.xlu1 %673  ;;  %v685_v34 = vrot.slane %v684_v8, 1 }
 0x1df   : > { %v675_v28 = vrot.slane %v674_v15, 1  ;;  %808 = vrot.lane.b32.xlu0 %v806_v27, %s1546_s19 }
 0x1e0   : > { %580 = vrot.lane.b32.xlu1 %v578_v13, %s1545_s12  ;;  %v686_v49 = vsel %vm472_vm11, %v684_v8, %v685_v34  ;;  %v720_v13 = vmul.f32 %v719_v44, %v717_v10  ;;  %s1448_s12 = scalar_lea.vmem %s994_s11, 128 }
 0x1e1   : > { %v676_v33 = vsel %vm461_vm10, %v674_v15, %v675_v28  ;;  %v691_v35 = vpop.permute.xlu0 %690  ;;  %p1449_p12 = scmp.ne.s32.totalorder %s994_s11, %s1448_s12 }
 0x1e2   : > { %v678_v37 = vadd.f32 %v676_v33, %v668_v31  ;;  %v902_v30 = vpop.permute.xlu1 %901  ;;  %v692_v43 = vrot.slane %v691_v35, 7 }
 0x1e3   : > { %v903_v46 = vrot.slane %v902_v30, 1  ;;  %p1450_p1 = pnand %p1449_p12, %p2080_p13 }
 0x1e4   : > { %529 = vrot.lane.b32.xlu1 %v527_v42, %s1546_s19  ;;  %v688_v59 = vadd.f32 %v686_v49, %v678_v37  ;;  %v694_v53 = vsel %vm693_vm13, %v692_v43, %v691_v35  ;;  %s1452_s19 = sshll.u32 %s1549_s28, 4  ;;  %s1453_s19 = int_to_ptr.vmem [resolvable:$false] %s1452_s19 }
 0x1e5   : > { %v904_v39 = vsel %vm472_vm11, %v902_v30, %v903_v46  ;;  %v727_v63 = vpop.permute.xlu0 %726  ;;  %v331_v46 = vld [vmem:[#allocation12] ss:$8 sm:$0x3]  ;;  %p1451_p8 = pneg %p1450_p1  ;;  %p1455_p2 = scmp.lt.s32.totalorder %s994_s11, %s1453_s19 }
 0x1e6   : > { %v906_v19 = vadd.f32 %v904_v39, %v896_v21  ;;  %v953_v52 = vpop.permute.xlu1 %952  ;;  %v696_v25 = vmul.f32 %v694_v53, %v688_v59  ;;  %v728_v3 = vrot.slane %v727_v63, 1 }
 0x1e7   : > { %v954_v24 = vrot.slane %v953_v52, 1 }
 0x1e8   : > { %639 = vrot.lane.b32.xlu1 %v1951_v51, %s1547_s18  ;;  %v907_v57 = vmul.f32 %v906_v19, %v1906_v40  ;;  %v427_v40 = vld [vmem:[#allocation2] ss:$2 sm:$0x3]  ;;  %v729_v8 = vsel %vm439_vm8, %v727_v63, %v728_v3 }
 0x1e9   : > { %v955_v58 = vsel %vm472_vm11, %v953_v52, %v954_v24  ;;  %v737_v1 = vpop.permute.xlu0 %736  ;;  %v430_v20 = vmul.f32 %v429_v62, %v427_v40  ;;  %v731_v28 = vadd.f32 %v729_v8, %v720_v13  ;;  %v967_v62 = vstv %s1202_s20 }
 0x1ea   : > { %v957_v60 = vadd.f32 %v955_v58, %v947_v55  ;;  %909 = vrot.lane.b32.xlu0 %v907_v57, %s1547_s18  ;;  %v437_v0 = vpop.permute.xlu1 %436  ;;  %v738_v38 = vrot.slane %v737_v1, 1  ;;  %s1454_s18 = scalar_lea.vmem %s1453_s19, 256 }
 0x1eb   : > { %v438_v51 = vrot.slane %v437_v0, 1  ;;  %p1456_p9 = scmp.lt.s32.totalorder %s1454_s18, %s1448_s12 }
 0x1ec   : > { %698 = vrot.lane.b32.xlu1 %v696_v25, %s1548_s25  ;;  %v958_v61 = vmul.f32 %v957_v60, %v694_v53  ;;  %v739_v16 = vsel %vm450_vm9, %v737_v1, %v738_v38 }
 0x1ed   : > { %v747_v14 = vpop.permute.xlu0 %746  ;;  %v440_v54 = vsel %vm439_vm8, %v437_v0, %v438_v51  ;;  %v741_v17 = vadd.f32 %v739_v16, %v731_v28  ;;  %p1457_p0 = por %p1456_p9, %p1455_p2 }
 0x1ee   : > { %960 = vrot.lane.b32.xlu0 %v958_v61, %s1548_s25  ;;  %v448_v2 = vpop.permute.xlu1 %447  ;;  %v748_v9 = vrot.slane %v747_v14, 1  ;;  %v442_v15 = vadd.f32 %v440_v54, %v430_v20 }
 0x1ef   : > { %v449_v4 = vrot.slane %v448_v2, 1  ;;  %p1458_p4 = pnand %p1457_p0, %p1451_p8 }
 0x1f0   : > { %v749_v29 = vsel %vm461_vm10, %v747_v14, %v748_v9  ;;  %v706_v14 = vstv %s705_s15 }
 0x1f1   : > { %v757_v5 = vpop.permute.xlu0 %756  ;;  %v451_v27 = vsel %vm450_vm9, %v448_v2, %v449_v4  ;;  %v751_v26 = vadd.f32 %v749_v29, %v741_v17 }
 0x1f2   : > { %v459_v56 = vpop.permute.xlu1 %458  ;;  %v758_v22 = vrot.slane %v757_v5, 1  ;;  %v453_v18 = vadd.f32 %v451_v27, %v442_v15 }
 0x1f3   : > { %v460_v7 = vrot.slane %v459_v56, 1 }
 0x1f4   : > { %v759_v35 = vsel %vm472_vm11, %v757_v5, %v758_v22 }
 0x1f5   : > { %v462_v23 = vsel %vm461_vm10, %v459_v56, %v460_v7  ;;  %v761_v30 = vadd.f32 %v759_v35, %v751_v26 }
 0x1f6   : > { %v470_v6 = vpop.permute.xlu1 %469  ;;  %v464_v32 = vadd.f32 %v462_v23, %v453_v18 }
 0x1f7   : > { %v471_v11 = vrot.slane %v470_v6, 1  ;;  %v762_v49 = vmul.f32 %v761_v30, %v331_v46 }
 0x1f9   : > { %v473_v31 = vsel %vm472_vm11, %v470_v6, %v471_v11 }
 0x1fa   : > { %v475_v36 = vadd.f32 %v473_v31, %v464_v32 }
 0x1fc   : > { %v476_v47 = vmul.f32 %v475_v36, %v331_v46 }
 0x24d   : > { %v859_v12 = vpop.permute.xlu0 %858 }
 0x24e   : > { %v860_v59 = vrot.slane %v859_v12, 1 }
 0x250   : > { %v861_v60 = vsel %vm583_vm15, %v859_v12, %v860_v59 }
 0x251   : > { %v809_v34 = vpop.permute.xlu0 %808 }
 0x252   : > { %v581_v33 = vpop.permute.xlu1 %580  ;;  %v810_v37 = vrot.slane %v809_v34, 1 }
 0x253   : > { %v582_v45 = vrot.slane %v581_v33, 1 }
 0x254   : > { %v811_v21 = vsel %vm532_vm14, %v809_v34, %v810_v37 }
 0x255   : > { %v584_v19 = vsel %vm583_vm15, %v581_v33, %v582_v45  ;;  %v813_v53 = vadd.f32 %v811_v21, %v762_v49 }
 0x256   : > { %v530_v42 = vpop.permute.xlu1 %529 }
 0x257   : > { %v531_v43 = vrot.slane %v530_v42, 1  ;;  %v863_v1 = vadd.f32 %v861_v60, %v813_v53 }
 0x259   : > { %v533_v48 = vsel %vm532_vm14, %v530_v42, %v531_v43 }
 0x25a   : > { %v535_v39 = vadd.f32 %v533_v48, %v476_v47  ;;  %v640_v50 = vpop.permute.xlu1 %639 }
 0x25b   : > { %v641_v52 = vrot.slane %v640_v50, 1 }
 0x25c   : > { %v586_v24 = vadd.f32 %v584_v19, %v535_v39  ;;  %v910_v55 = vpop.permute.xlu0 %909 }
 0x25d   : > { %v643_v57 = vsel %vm642_vm0, %v640_v50, %v641_v52  ;;  %v911_v58 = vrot.slane %v910_v55, 1 }
 0x25e   : > { %v699_v25 = vpop.permute.xlu1 %698  ;;  %v645_v0 = vadd.f32 %v643_v57, %v586_v24 }
 0x25f   : > { %v912_v61 = vsel %vm642_vm0, %v910_v55, %v911_v58  ;;  %v700_v63 = vrot.slane %v699_v25, 1 }
 0x260   : > { %v961_v2 = vpop.permute.xlu0 %960  ;;  %v914_v3 = vadd.f32 %v912_v61, %v863_v1 }
 0x261   : > { %v702_v56 = vsel %vm701_vm1, %v699_v25, %v700_v63  ;;  %v962_v51 = vrot.slane %v961_v2, 1 }
 0x262   : > { %v704_v40 = vadd.f32 %v702_v56, %v645_v0 }
 0x263   : > { %v963_v4 = vsel %vm701_vm1, %v961_v2, %v962_v51 }
 0x264   : > { %v707_v5 = vadd.f32 %v706_v14, %v704_v40  ;;  %v965_v6 = vadd.f32 %v963_v4, %v914_v3 }
 0x266   : > { %v1175_v10 = vmul.f32 -1.442695, %v707_v5  ;;  %v968_v44 = vadd.f32 %v967_v62, %v965_v6 }
 0x268   : > { %1330 = vpow2.f32 %v1175_v10  ;;  %v1203_v54 = vmul.f32 -1.442695, %v968_v44 }
 0x26a   : > { %1332 = vpow2.f32 %v1203_v54 }
 0x275   : > { %v1331_v38 = vpop.eup %1330 }
 0x276   : > { %v711_v7 = vadd.f32 1.0, %v1331_v38 }
 0x277   : > { %v1333_v20 = vpop.eup %1332 }
 0x278   : > { %1334 = vrcp.f32 %v711_v7  ;;  %v972_v8 = vadd.f32 1.0, %v1333_v20 }
 0x27a   : > { %1336 = vrcp.f32 %v972_v8 }
 0x285   : > { %v1335_v27 = vpop.eup %1334 }
 0x286   : > { %v714_v9 = vmul.f32 %v1335_v27, %v707_v5 }
 0x287   : > { %v1337_v11 = vpop.eup %1336 }
 0x288   : > { %1176 = vst.msk [vmem:[%s1771_s26 + $0x1] ss:$4 sm:$0x3] %vm1765_vm2, %v714_v9  ;;  %v975_v12 = vmul.f32 %v1337_v11, %v968_v44 }
 0x28a   : > { %1204 = vst.msk [vmem:[%s1771_s26 + $0x3] ss:$4 sm:$0x3] %vm1765_vm2, %v975_v12 }
 0x28b   : > { %1461 = shalt.err (!%p1458_p4)
}
 0x28c   : > { %s1462_s25 = scalar_lea.hbm %s991_s8, 128  ;;  %s1466_s27 = scalar_lea.hbm %s2052_s6, 256 }
 0x28d   : > { %p1463_p7 = scmp.ne.s32.totalorder %s991_s8, %s1462_s25  ;;  %p1467_p6 = scmp.lt.s32.totalorder %s991_s8, %s2052_s6 }
 0x28e   : > { %p1468_p5 = scmp.lt.s32.totalorder %s1466_s27, %s1462_s25 }
 0x28f   : > { %p1464_p3 = pnand %p1463_p7, %p2080_p13 }
 0x290   : > { %p1469_p10 = por %p1468_p5, %p1467_p6 }
 0x291   : > { %p1465_p11 = pneg %p1464_p3 }
 0x293   : > { %p1470_p12 = pnand %p1469_p10, %p1465_p11 }
 0x295   : > { %1473 = shalt.err (!%p1470_p12)
}
 0x296   : > { %1234 = dma.vmem_to_hbm [thread:$0]  (%p2080_p13), %s994_s11, 128, %s991_s8, %s979_s9  }
 0x297 PF: > { %s1005_s20 = sand.u32 1, %s1516_s21   ;;  %p2081_p1 = scmp.ne.s32.totalorder %s2064_s17, 0 }
 0x298   : > { %p2082_p8 = scmp.ge.s32.totalorder %s1528_s24, 2  ;;  %s1006_s16 = scalar_lea.sflag [#allocation5], %s1005_s20 }
 0x29a   : > { %p1257_p2 = pnand %p2082_p8, %p2081_p1 }
 0x29c   : > { %p1258_p9 = pneg %p1257_p2 }
 0x29e   : > { %1511 = dma.done.wait (%p1258_p9), %s1006_s16, 128  }
 0x29f   : > { %1513 = vsyncadd (%p1258_p9), %s1006_s16, 4294967168  ;;  %p23_p0 = scmp.ge.s32.totalorder %s1682_s10, 4   ;;  %s2083_s21 = smov %s1520_s22 }
 0x2a0   : > { %s2084_s22 = smov %s1524_s23  ;;  %s2085_s23 = smov %s1694_s13 }
 0x2a1   : > { %s2086_s24 = smov %s1682_s10  ;;  %25 = sbr.rel (!%p23_p0) target bundleno = 11 (0xb), region = 122 }
 0x2a6   :  { %1011 = vsyncpa [#allocation4], 1 }
 0x2a7   :  { %1013 = vsyncpa [#allocation4 + $0x1], 1 }
 0x2a8   :  { %1014 = vsyncpa [#allocation14], 1 }
 0x2a9   :  { %1016 = vsyncpa [#allocation14 + $0x1], 1 }
 0x2aa   :  { %1017 = vsyncpa [#allocation5], 1 }
 0x2ab   :  { %1019 = vsyncpa [#allocation5 + $0x1], 1 }
 0x2ac   :  { %1020 = vsyncpa [#allocation6], 1 }
 0x2ad   :  { %1022 = vsyncpa [#allocation6 + $0x1], 1 }
 0x2ae   :  { %1023 = vsyncpa [#allocation7], 1 }
 0x2af   :  { %1025 = vsyncpa [#allocation7 + $0x1], 1 }
 0x2b0   :  { %1026 = vsyncpa [#allocation10], 1 }

</bundles_post_ra>
